<compile_context>
chip_gen: v5e
topology: v5e:2x2
jax: 0.10.0
libtpu: 0.0.40
codegen_flags: <defaults>
</compile_context>

<pallas_src>
import math

import numpy as np
import jax
import jax.numpy as jnp
from jax.experimental import pallas as pl
from jax.experimental.pallas import tpu as pltpu


# ----------------------------------------------------------------------------
# Helper matrices (exact PyTorch semantics, built on host with numpy).
# ----------------------------------------------------------------------------
def _adaptive_pool_matrix(out_size: int, in_size: int) -> jnp.ndarray:
    """Row-stochastic matrix P (out_size, in_size): AdaptiveAvgPool1d semantics."""
    P = np.zeros((out_size, in_size), dtype=np.float32)
    for i in range(out_size):
        start = (i * in_size) // out_size
        end = math.ceil((i + 1) * in_size / out_size)
        P[i, start:end] = 1.0 / (end - start)
    return jnp.asarray(P)


def _bilinear_matrix(out_size: int, in_size: int) -> jnp.ndarray:
    """Matrix U (out_size, in_size): F.interpolate bilinear, align_corners=False."""
    scale = in_size / out_size
    i = np.arange(out_size, dtype=np.float64)
    src = (i + 0.5) * scale - 0.5
    src = np.maximum(src, 0.0)
    idx0 = np.minimum(np.floor(src).astype(np.int64), in_size - 1)
    idx1 = np.minimum(idx0 + 1, in_size - 1)
    lam1 = src - idx0
    lam0 = 1.0 - lam1
    U = np.zeros((out_size, in_size), dtype=np.float32)
    rows = np.arange(out_size)
    U[rows, idx0] += lam0
    U[rows, idx1] += lam1
    return jnp.asarray(U)


# ----------------------------------------------------------------------------
# Tiling helpers.
# ----------------------------------------------------------------------------
def _round_up(a: int, m: int) -> int:
    return ((a + m - 1) // m) * m


def _tile_and_pad(dim: int, pref: int, align: int):
    """Pick a tile size (full dim if tiny, else `align`-aligned, capped at
    `pref`) and the padded array extent it implies."""
    if dim <= align:
        return dim, dim                       # block == full (padded) dim
    if dim <= pref:
        t = _round_up(dim, align)
        return t, t
    return pref, _round_up(dim, pref)         # pref is a multiple of align


# ----------------------------------------------------------------------------
# Pallas kernel: tiled 1x1-conv matmul + stage-branch sum + bias + ReLU.
#   grid = (M tiles, F tiles, K tiles); K innermost with f32 accumulator.
# ----------------------------------------------------------------------------
def _bottleneck_kernel(x_ref, w_ref, s_ref, b_ref, o_ref, acc_ref):
    k = pl.program_id(2)

    @pl.when(k == 0)
    def _():
        acc_ref[...] = jnp.zeros_like(acc_ref)

    acc_ref[...] += jnp.dot(x_ref[...], w_ref[...],
                            preferred_element_type=jnp.float32)

    @pl.when(k == pl.num_programs(2) - 1)
    def _():
        res = acc_ref[...] + s_ref[...] + b_ref[...]
        o_ref[...] = jnp.maximum(res, 0.0).astype(o_ref.dtype)


def bottleneck_conv_relu(x2d: jnp.ndarray, w: jnp.ndarray,
                         stage2d: jnp.ndarray, b: jnp.ndarray,
                         *, tm: int = 512, tn: int = 512,
                         tk: int = 1024) -> jnp.ndarray:
    """relu(x2d @ w + stage2d + b).

    x2d: (N, K) pixels-by-channels, w: (K, F), stage2d: (N, F), b: (F,).
    """
    N, K = x2d.shape
    F_out = w.shape[1]

    tm, N_pad = _tile_and_pad(N, tm, 8)
    tk, K_pad = _tile_and_pad(K, tk, 128)
    tn, F_pad = _tile_and_pad(F_out, tn, 128)

    x_p = jnp.pad(x2d, ((0, N_pad - N), (0, K_pad - K))).astype(jnp.bfloat16)
    w_p = jnp.pad(w, ((0, K_pad - K), (0, F_pad - F_out))).astype(jnp.bfloat16)
    s_p = jnp.pad(stage2d, ((0, N_pad - N), (0, F_pad - F_out))).astype(jnp.float32)
    b_p = jnp.pad(b, (0, F_pad - F_out)).reshape(1, F_pad).astype(jnp.float32)

    grid = (N_pad // tm, F_pad // tn, K_pad // tk)

    # Advisory cost + explicit VMEM budget derived from the chosen tiles.
    flops = 2 * N_pad * K_pad * F_pad
    bytes_accessed = (N_pad * K_pad * 2 + K_pad * F_pad * 2
                      + 2 * N_pad * F_pad * 4 + F_pad * 4)
    per_buf = tm * tk * 2 + tk * tn * 2 + tm * tn * 4 + tn * 4 + tm * tn * 4
    vmem_limit = 2 * (2 * per_buf + tm * tn * 4) + (2 << 20)
    vmem_limit = int(max(4 << 20, min(vmem_limit, 48 << 20)))

    out = pl.pallas_call(
        _bottleneck_kernel,
        out_shape=jax.ShapeDtypeStruct((N_pad, F_pad), jnp.float32),
        grid_spec=pltpu.PrefetchScalarGridSpec(
            num_scalar_prefetch=0,
            grid=grid,
            in_specs=[
                pl.BlockSpec((tm, tk), lambda i, j, k: (i, k)),   # activations
                pl.BlockSpec((tk, tn), lambda i, j, k: (k, j)),   # weight panel
                pl.BlockSpec((tm, tn), lambda i, j, k: (i, j)),   # stage-branch sum
                pl.BlockSpec((1, tn), lambda i, j, k: (0, j)),    # bias
            ],
            out_specs=pl.BlockSpec((tm, tn), lambda i, j, k: (i, j)),
            scratch_shapes=[pltpu.VMEM((tm, tn), jnp.float32)],
        ),
        compiler_params=pltpu.CompilerParams(
            dimension_semantics=("parallel", "parallel", "arbitrary"),
            vmem_limit_bytes=vmem_limit,
        ),
        cost_estimate=pl.CostEstimate(
            flops=flops, transcendentals=0, bytes_accessed=bytes_accessed),
    )(x_p, w_p, s_p, b_p)
    return out[:N, :F_out]


# ----------------------------------------------------------------------------
# PSPModule forward (bottleneck weight split + stage branches folded).
# ----------------------------------------------------------------------------
def psp_module_forward(feats_nchw: jnp.ndarray, params: dict,
                       sizes=(1, 2, 3, 6)) -> jnp.ndarray:
    B, C, H, W = feats_nchw.shape
    x = jnp.transpose(feats_nchw, (0, 2, 3, 1))          # NHWC
    F_out = params["bottleneck_b"].shape[0]

    # Split bottleneck weight by concat order: [stage_1, stage_2, stage_3,
    # stage_6, identity(x)] along input channels.
    W_full = params["bottleneck_w"]                       # (5C, F)
    chunks = [W_full[i * C:(i + 1) * C] for i in range(len(sizes) + 1)]
    W_stage_chunks, W_x = chunks[:-1], chunks[-1]

    # Stage contributions, folded: upsample(pool(x) @ (w_stage_i @ W_chunk_i)).
    # All work before the upsample is at s*s pixels (tiny); done in plain JAX.
    stage_sum = jnp.zeros((B, H, W, F_out), jnp.float32)
    for s, w_stage, W_chunk in zip(sizes, params["stage_weights"],
                                   W_stage_chunks):
        P_h = _adaptive_pool_matrix(s, H)                 # (s, H)
        P_w = _adaptive_pool_matrix(s, W)                 # (s, W)
        U_h = _bilinear_matrix(H, s)                      # (H, s)
        U_w = _bilinear_matrix(W, s)                      # (W, s)
        pooled = jnp.einsum("bhwc,ph,qw->bpqc", x, P_h, P_w)       # (B,s,s,C)
        folded_w = w_stage @ W_chunk                                # (C,F)
        contr = jnp.einsum("bpqc,cf->bpqf", pooled, folded_w)       # (B,s,s,F)
        stage_sum = stage_sum + jnp.einsum("bpqf,hp,wq->bhwf",
                                           contr, U_h, U_w)

    x_flat = x.reshape(B * H * W, C)
    s_flat = stage_sum.reshape(B * H * W, F_out)

    out2d = bottleneck_conv_relu(x_flat, W_x, s_flat, params["bottleneck_b"])
    out = out2d.reshape(B, H, W, F_out)
    return jnp.transpose(out, (0, 3, 1, 2))               # back to NCHW


def init_params(key, features, out_features, sizes):
    keys = jax.random.split(key, len(sizes) + 2)
    # stage conv weights: Conv2d(features, features, 1, bias=False)
    # stored as (C_in, C_out) matrices (weight[c_out, c_in, 0, 0].T)
    stage_weights = [
        0.1 * jax.random.normal(keys[i], (features, features), jnp.float32)
        for i in range(len(sizes))
    ]
    k_in = features * (len(sizes) + 1)
    bottleneck_w = 0.1 * jax.random.normal(keys[-2], (k_in, out_features),
                                           jnp.float32)
    bottleneck_b = 0.1 * jax.random.normal(keys[-1], (out_features,),
                                           jnp.float32)
    return dict(stage_weights=stage_weights,
                bottleneck_w=bottleneck_w,
                bottleneck_b=bottleneck_b)


if __name__ == "__main__":
    key = jax.random.PRNGKey(0)
    B, C, H, W = 2, 4, 16, 16
    out_features = 32        # small stand-in for default 1024
    sizes = (1, 2, 3, 6)

    k_x, k_p = jax.random.split(key)
    feats = jax.random.normal(k_x, (B, C, H, W), jnp.float32)
    params = init_params(k_p, C, out_features, sizes)

    fwd = jax.jit(psp_module_forward, static_argnames=("sizes",))
    out = fwd(feats, params, sizes=sizes)
    out = jax.block_until_ready(out)
    assert out.shape == (B, out_features, H, W), out.shape

    # Self-check vs pure-JAX f32 reference of the ORIGINAL (unfolded) module
    # math.  Tolerance loosened because the kernel's matmul inputs are bf16.
    x_nhwc = jnp.transpose(feats, (0, 2, 3, 1))
    prior_list = []
    for s, w_stage in zip(sizes, params["stage_weights"]):
        pooled = jnp.einsum("bhwc,ph,qw->bpqc", x_nhwc,
                            _adaptive_pool_matrix(s, H),
                            _adaptive_pool_matrix(s, W))
        conved = jnp.einsum("bpqc,cd->bpqd", pooled, w_stage)
        prior_list.append(jnp.einsum("bpqd,hp,wq->bhwd", conved,
                                     _bilinear_matrix(H, s),
                                     _bilinear_matrix(W, s)))
    prior_list.append(x_nhwc)
    cat_ref = jnp.concatenate(prior_list, axis=-1)
    ref = jnp.maximum(
        jnp.einsum("bhwk,kf->bhwf", cat_ref, params["bottleneck_w"])
        + params["bottleneck_b"], 0.0)
    ref = jnp.transpose(ref, (0, 3, 1, 2))
    np.testing.assert_allclose(np.asarray(out), np.asarray(ref),
                               rtol=2e-2, atol=2e-2)

    print("KERNEL_OK")
</pallas_src>

<mosaic_0001>
module attributes {stable_mosaic.version = 11 : i64} {
  func.func @_bottleneck_kernel(%arg0: i32, %arg1: i32, %arg2: i32, %arg3: memref<512x4xbf16, #tpu.memory_space<vmem>>, %arg4: memref<4x32xbf16, #tpu.memory_space<vmem>>, %arg5: memref<512x32xf32, #tpu.memory_space<vmem>>, %arg6: memref<1x32xf32, #tpu.memory_space<vmem>>, %arg7: memref<512x32xf32, #tpu.memory_space<vmem>>, %arg8: memref<512x32xf32, #tpu.memory_space<vmem>>) attributes {dimension_semantics = [#tpu.dimension_semantics<parallel>, #tpu.dimension_semantics<parallel>, #tpu.dimension_semantics<arbitrary>], iteration_bounds = array<i64: 1, 1, 1>, scalar_prefetch = 0 : i64, scratch_operands = 1 : i64, tpu.core_type = #tpu.core_type<tc>, window_params = [{transform_indices = @transform_0, window_bounds = array<i64: 512, 4>}, {transform_indices = @transform_1, window_bounds = array<i64: 4, 32>}, {transform_indices = @transform_2, window_bounds = array<i64: 512, 32>}, {transform_indices = @transform_3, window_bounds = array<i64: 1, 32>}, {transform_indices = @transform_4, window_bounds = array<i64: 512, 32>}]} {
    %c0_i32 = arith.constant 0 : i32
    %0 = arith.cmpi eq, %arg2, %c0_i32 : i32
    %1 = arith.extui %0 : i1 to i32
    %c0_i32_0 = arith.constant 0 : i32
    %2 = arith.cmpi ne, %1, %c0_i32_0 : i32
    scf.if %2 {
      %cst_10 = arith.constant 0.000000e+00 : f32
      %12 = vector.broadcast %cst_10 : f32 to vector<512x32xf32>
      %c0_11 = arith.constant 0 : index
      %c0_12 = arith.constant 0 : index
      %13 = vector.load %arg8[%c0_11, %c0_12] : memref<512x32xf32, #tpu.memory_space<vmem>>, vector<512x32xf32>
      tpu.vector_store %arg8[%c0_11, %c0_12], %12 {strides = array<i32>} : memref<512x32xf32, #tpu.memory_space<vmem>>, vector<512x32xf32>,
    } else {
    }
    %c0 = arith.constant 0 : index
    %c0_1 = arith.constant 0 : index
    %3 = vector.load %arg8[%c0, %c0_1] : memref<512x32xf32, #tpu.memory_space<vmem>>, vector<512x32xf32>
    %c0_2 = arith.constant 0 : index
    %c0_3 = arith.constant 0 : index
    %4 = vector.load %arg3[%c0_2, %c0_3] : memref<512x4xbf16, #tpu.memory_space<vmem>>, vector<512x4xbf16>
    %c0_4 = arith.constant 0 : index
    %c0_5 = arith.constant 0 : index
    %5 = vector.load %arg4[%c0_4, %c0_5] : memref<4x32xbf16, #tpu.memory_space<vmem>>, vector<4x32xbf16>
    %cst = arith.constant dense<0.000000e+00> : vector<512x32xf32>
    %6 = tpu.matmul %4, %5, %cst {dimension_numbers = #tpu.dot_dimension_numbers<[1], [0], [0], [1], [0, 0, 1, 1], [], []>} : vector<512x4xbf16>, vector<4x32xbf16>, vector<512x32xf32> -> vector<512x32xf32>
    %7 = arith.addf %3, %6 : vector<512x32xf32>
    %c0_6 = arith.constant 0 : index
    %c0_7 = arith.constant 0 : index
    %8 = vector.load %arg8[%c0_6, %c0_7] : memref<512x32xf32, #tpu.memory_space<vmem>>, vector<512x32xf32>
    tpu.vector_store %arg8[%c0_6, %c0_7], %7 {strides = array<i32>} : memref<512x32xf32, #tpu.memory_space<vmem>>, vector<512x32xf32>,
    %c0_i32_8 = arith.constant 0 : i32
    %9 = arith.cmpi eq, %arg2, %c0_i32_8 : i32
    %10 = arith.extui %9 : i1 to i32
    %c0_i32_9 = arith.constant 0 : i32
    %11 = arith.cmpi ne, %10, %c0_i32_9 : i32
    scf.if %11 {
      %c0_10 = arith.constant 0 : index
      %c0_11 = arith.constant 0 : index
      %12 = vector.load %arg8[%c0_10, %c0_11] : memref<512x32xf32, #tpu.memory_space<vmem>>, vector<512x32xf32>
      %c0_12 = arith.constant 0 : index
      %c0_13 = arith.constant 0 : index
      %13 = vector.load %arg5[%c0_12, %c0_13] : memref<512x32xf32, #tpu.memory_space<vmem>>, vector<512x32xf32>
      %14 = arith.addf %12, %13 : vector<512x32xf32>
      %c0_14 = arith.constant 0 : index
      %c0_15 = arith.constant 0 : index
      %15 = vector.load %arg6[%c0_14, %c0_15] : memref<1x32xf32, #tpu.memory_space<vmem>>, vector<1x32xf32>
      %16 = vector.broadcast %15 : vector<1x32xf32> to vector<512x32xf32>
      %17 = arith.addf %14, %16 : vector<512x32xf32>
      %cst_16 = arith.constant 0.000000e+00 : f32
      %18 = vector.broadcast %cst_16 : f32 to vector<512x32xf32>
      %19 = arith.maximumf %17, %18 : vector<512x32xf32>
      %c0_17 = arith.constant 0 : index
      %c0_18 = arith.constant 0 : index
      %20 = vector.load %arg7[%c0_17, %c0_18] : memref<512x32xf32, #tpu.memory_space<vmem>>, vector<512x32xf32>
      tpu.vector_store %arg7[%c0_17, %c0_18], %19 {strides = array<i32>} : memref<512x32xf32, #tpu.memory_space<vmem>>, vector<512x32xf32>,
    } else {
    }
    return
  }
  func.func @transform_0(%arg0: i32, %arg1: i32, %arg2: i32) -> (i32, i32) {
    %c0_i32 = arith.constant 0 : i32
    return %arg0, %arg2 : i32, i32
  }
  func.func @transform_1(%arg0: i32, %arg1: i32, %arg2: i32) -> (i32, i32) {
    %c0_i32 = arith.constant 0 : i32
    return %arg2, %arg1 : i32, i32
  }
  func.func @transform_2(%arg0: i32, %arg1: i32, %arg2: i32) -> (i32, i32) {
    %c0_i32 = arith.constant 0 : i32
    return %arg0, %arg1 : i32, i32
  }
  func.func @transform_3(%arg0: i32, %arg1: i32, %arg2: i32) -> (i32, i32) {
    %c0_i32 = arith.constant 0 : i32
    %c0_i32_0 = arith.constant 0 : i32
    return %c0_i32, %arg1 : i32, i32
  }
  func.func @transform_4(%arg0: i32, %arg1: i32, %arg2: i32) -> (i32, i32) {
    %c0_i32 = arith.constant 0 : i32
    return %arg0, %arg1 : i32, i32
  }
}

</mosaic_0001>

<bundles_post_ra>
// kernel: psp_module_forward.1
= control target key start
LH: loop header
LB: loop body
LE: loop exit
PB: predicated region body
PF: predicated region fallthrough
CT: control target
= control target key end

     0   :  { %vm474_vm0 = vcmask 1041408   ;;  %vm377_vm1 = vcmask 31744   ;;  %s2130_s0 = inlined_call_operand.vmem [shape: bf16[512,4], index: 0, kind: input, shape index: {}]   ;;  %s2131_s1 = inlined_call_operand.vmem [shape: bf16[4,32], index: 1, kind: input, shape index: {}]   ;;  %s2132_s2 = inlined_call_operand.vmem [shape: f32[512,32], index: 2, kind: input, shape index: {}]   ;;  %s2133_s3 = inlined_call_operand.vmem [shape: f32[1,32], index: 3, kind: input, shape index: {}]   ;;  %s2134_s4 = inlined_call_operand.hbm [shape: f32[512,32], index: 4, kind: output, shape index: {}]  }
   0x1   :  { %v216_v0 = vld [vmem:[%s2131_s1] sm:$0x3] }
   0x2   :  { %v476_v1 = vsel %vm474_vm0, %v216_v0, 0  ;;  %v1345_v2 = vld [vmem:[%s2130_s0] sm:$0xff] }
   0x3   :  { %v1353_v3 = vld [vmem:[%s2130_s0 + $0x40] sm:$0xff]  ;;  %485 = vmatpush.bf16.msra.mxu0 %v476_v1  ;;  %1377 = vmatpush.bf16.msra.mxu1 %v476_v1 }
   0x4   :  { %v1361_v4 = vld [vmem:[%s2130_s0 + $0x80] sm:$0xff]  ;;  %1378 = vmatpush.bf16.msra.mxu2 %v476_v1  ;;  %1379 = vmatpush.bf16.msra.mxu3 %v476_v1 }
   0x5   :  { %v1369_v5 = vld [vmem:[%s2130_s0 + $0xc0] sm:$0xff] }
   0x6   :  { %9 = vsyncpa [#allocation4], 0  ;;  %1313 = vmatmul.msk.bf16.vlgmr.msra.gmra.mxu0 %vm377_vm1, %v1345_v2  ;;  %1321 = vmatmul.msk.bf16.vlgmr.msra.gmra.mxu1 %vm377_vm1, %v1353_v3  ;;  %v1346_v6 = vld [vmem:[%s2130_s0 + $0x8] sm:$0xff]  ;;  %v1347_v10 = vld [vmem:[%s2130_s0 + $0x10] sm:$0xff]  ;;  %vm23_vm2 = vcmask 261120   ;;  %v1412_v26 = vmov 0.0  }
   0x7   :  { %1329 = vmatmul.msk.bf16.vlgmr.msra.gmra.mxu2 %vm377_vm1, %v1361_v4  ;;  %1337 = vmatmul.msk.bf16.vlgmr.msra.gmra.mxu3 %vm377_vm1, %v1369_v5  ;;  %v1354_v7 = vld [vmem:[%s2130_s0 + $0x48] sm:$0xff]  ;;  %v1355_v11 = vld [vmem:[%s2130_s0 + $0x50] sm:$0xff]  ;;  %v1348_v14 = vld [vmem:[%s2130_s0 + $0x18] sm:$0xff]  ;;  %24 = vst.msk [vmem:[#allocation2] sm:$0xff] %vm23_vm2, %v1412_v26  ;;  %s1413_s18 = smov [#allocation3]   ;;  %s1173_s21 = sshll.u32 %s2134_s4, 4  ;;  %s1174_s21 = int_to_ptr.hbm [resolvable:$true] %s1173_s21 }
   0x8   :  { %v1362_v8 = vld [vmem:[%s2130_s0 + $0x88] sm:$0xff]  ;;  %v1363_v12 = vld [vmem:[%s2130_s0 + $0x90] sm:$0xff]  ;;  %v1356_v15 = vld [vmem:[%s2130_s0 + $0x58] sm:$0xff]  ;;  %25 = vst.msk [vmem:[#allocation2 + $0x8] sm:$0xff] %vm23_vm2, %v1412_v26  ;;  %s1171_s19 = sshll.u32 %s1413_s18, 4  ;;  %s1414_s4 = smov 128   ;;  %s1172_s19 = int_to_ptr.vmem [resolvable:$true] %s1171_s19 }
   0x9   :  { %v1370_v9 = vld [vmem:[%s2130_s0 + $0xc8] sm:$0xff]  ;;  %v1371_v13 = vld [vmem:[%s2130_s0 + $0xd0] sm:$0xff]  ;;  %v1364_v16 = vld [vmem:[%s2130_s0 + $0x98] sm:$0xff]  ;;  %26 = vst.msk [vmem:[#allocation2 + $0x10] sm:$0xff] %vm23_vm2, %v1412_v26  ;;  %s1415_s22 = smov 8  }
   0xa   :  { %v1372_v17 = vld [vmem:[%s2130_s0 + $0xd8] sm:$0xff]  ;;  %v1349_v18 = vld [vmem:[%s2130_s0 + $0x20] sm:$0xff]  ;;  %v1350_v22 = vld [vmem:[%s2130_s0 + $0x28] sm:$0xff]  ;;  %27 = vst.msk [vmem:[#allocation2 + $0x18] sm:$0xff] %vm23_vm2, %v1412_v26 }
   0xb   :  { %v1357_v19 = vld [vmem:[%s2130_s0 + $0x60] sm:$0xff]  ;;  %v1358_v23 = vld [vmem:[%s2130_s0 + $0x68] sm:$0xff]  ;;  %28 = vst.msk [vmem:[#allocation2 + $0x20] sm:$0xff] %vm23_vm2, %v1412_v26  ;;  %v1351_v27 = vld [vmem:[%s2130_s0 + $0x30] sm:$0xff] }
   0xc   :  { %v1365_v20 = vld [vmem:[%s2130_s0 + $0xa0] sm:$0xff]  ;;  %v1366_v24 = vld [vmem:[%s2130_s0 + $0xa8] sm:$0xff]  ;;  %29 = vst.msk [vmem:[#allocation2 + $0x28] sm:$0xff] %vm23_vm2, %v1412_v26  ;;  %v1359_v28 = vld [vmem:[%s2130_s0 + $0x70] sm:$0xff] }
   0xd   :  { %v1373_v21 = vld [vmem:[%s2130_s0 + $0xe0] sm:$0xff]  ;;  %v1374_v25 = vld [vmem:[%s2130_s0 + $0xe8] sm:$0xff]  ;;  %30 = vst.msk [vmem:[#allocation2 + $0x30] sm:$0xff] %vm23_vm2, %v1412_v26  ;;  %v1367_v29 = vld [vmem:[%s2130_s0 + $0xb0] sm:$0xff] }
   0xe   :  { %31 = vst.msk [vmem:[#allocation2 + $0x38] sm:$0xff] %vm23_vm2, %v1412_v26  ;;  %v1375_v30 = vld [vmem:[%s2130_s0 + $0xf0] sm:$0xff]  ;;  %v1352_v31 = vld [vmem:[%s2130_s0 + $0x38] sm:$0xff]  ;;  %v88_v35 = vld [vmem:[#allocation2] sm:$0xff] }
   0xf   :  { %32 = vst.msk [vmem:[#allocation2 + $0x40] sm:$0xff] %vm23_vm2, %v1412_v26  ;;  %v1360_v32 = vld [vmem:[%s2130_s0 + $0x78] sm:$0xff]  ;;  %v843_v41 = vld [vmem:[%s2132_s2] sm:$0xff]  ;;  %v89_v57 = vld [vmem:[#allocation2 + $0x8] sm:$0xff] }
  0x10   :  { %33 = vst.msk [vmem:[#allocation2 + $0x48] sm:$0xff] %vm23_vm2, %v1412_v26  ;;  %v1368_v33 = vld [vmem:[%s2130_s0 + $0xb8] sm:$0xff]  ;;  %v1681_v44 = vld [vmem:[%s2133_s3] ss:$0 sm:$0xff]  ;;  %v90_v1 = vld [vmem:[#allocation2 + $0x10] sm:$0xff] }
  0x11   :  { %34 = vst.msk [vmem:[#allocation2 + $0x50] sm:$0xff] %vm23_vm2, %v1412_v26  ;;  %v1376_v34 = vld [vmem:[%s2130_s0 + $0xf8] sm:$0xff] }
  0x12   :  { %35 = vst.msk [vmem:[#allocation2 + $0x58] sm:$0xff] %vm23_vm2, %v1412_v26 }
  0x13   :  { %36 = vst.msk [vmem:[#allocation2 + $0x60] sm:$0xff] %vm23_vm2, %v1412_v26 }
  0x14   :  { %37 = vst.msk [vmem:[#allocation2 + $0x68] sm:$0xff] %vm23_vm2, %v1412_v26 }
  0x15   :  { %38 = vst.msk [vmem:[#allocation2 + $0x70] sm:$0xff] %vm23_vm2, %v1412_v26 }
  0x16   :  { %1314 = vmatmul.msk.bf16.gmra.mxu0 %vm377_vm1, %v1346_v6  ;;  %1322 = vmatmul.msk.bf16.gmra.mxu1 %vm377_vm1, %v1354_v7  ;;  %39 = vst.msk [vmem:[#allocation2 + $0x78] sm:$0xff] %vm23_vm2, %v1412_v26 }
  0x17   :  { %1330 = vmatmul.msk.bf16.gmra.mxu2 %vm377_vm1, %v1362_v8  ;;  %1338 = vmatmul.msk.bf16.gmra.mxu3 %vm377_vm1, %v1370_v9  ;;  %40 = vst.msk [vmem:[#allocation2 + $0x80] sm:$0xff] %vm23_vm2, %v1412_v26 }
  0x18   :  { %41 = vst.msk [vmem:[#allocation2 + $0x88] sm:$0xff] %vm23_vm2, %v1412_v26 }
  0x19   :  { %42 = vst.msk [vmem:[#allocation2 + $0x90] sm:$0xff] %vm23_vm2, %v1412_v26 }
  0x1a   :  { %43 = vst.msk [vmem:[#allocation2 + $0x98] sm:$0xff] %vm23_vm2, %v1412_v26 }
  0x1b   :  { %44 = vst.msk [vmem:[#allocation2 + $0xa0] sm:$0xff] %vm23_vm2, %v1412_v26 }
  0x1c   :  { %45 = vst.msk [vmem:[#allocation2 + $0xa8] sm:$0xff] %vm23_vm2, %v1412_v26 }
  0x1d   :  { %46 = vst.msk [vmem:[#allocation2 + $0xb0] sm:$0xff] %vm23_vm2, %v1412_v26 }
  0x1e   :  { %47 = vst.msk [vmem:[#allocation2 + $0xb8] sm:$0xff] %vm23_vm2, %v1412_v26  ;;  %v104_v51 = vld [vmem:[#allocation2 + $0x80] sm:$0xff] }
  0x1f   :  { %48 = vst.msk [vmem:[#allocation2 + $0xc0] sm:$0xff] %vm23_vm2, %v1412_v26  ;;  %v105_v59 = vld [vmem:[#allocation2 + $0x88] sm:$0xff] }
  0x20   :  { %49 = vst.msk [vmem:[#allocation2 + $0xc8] sm:$0xff] %vm23_vm2, %v1412_v26  ;;  %v106_v5 = vld [vmem:[#allocation2 + $0x90] sm:$0xff] }
  0x21   :  { %50 = vst.msk [vmem:[#allocation2 + $0xd0] sm:$0xff] %vm23_vm2, %v1412_v26 }
  0x22   :  { %51 = vst.msk [vmem:[#allocation2 + $0xd8] sm:$0xff] %vm23_vm2, %v1412_v26 }
  0x23   :  { %52 = vst.msk [vmem:[#allocation2 + $0xe0] sm:$0xff] %vm23_vm2, %v1412_v26 }
  0x24   :  { %53 = vst.msk [vmem:[#allocation2 + $0xe8] sm:$0xff] %vm23_vm2, %v1412_v26 }
  0x25   :  { %54 = vst.msk [vmem:[#allocation2 + $0xf0] sm:$0xff] %vm23_vm2, %v1412_v26 }
  0x26   :  { %1315 = vmatmul.msk.bf16.gmra.mxu0 %vm377_vm1, %v1347_v10  ;;  %1323 = vmatmul.msk.bf16.gmra.mxu1 %vm377_vm1, %v1355_v11  ;;  %55 = vst.msk [vmem:[#allocation2 + $0xf8] sm:$0xff] %vm23_vm2, %v1412_v26 }
  0x27   :  { %1331 = vmatmul.msk.bf16.gmra.mxu2 %vm377_vm1, %v1363_v12  ;;  %1339 = vmatmul.msk.bf16.gmra.mxu3 %vm377_vm1, %v1371_v13  ;;  %56 = vst.msk [vmem:[#allocation2 + $0x100] sm:$0xff] %vm23_vm2, %v1412_v26  ;;  %v91_v13 = vld [vmem:[#allocation2 + $0x18] sm:$0xff] }
  0x28   :  { %57 = vst.msk [vmem:[#allocation2 + $0x108] sm:$0xff] %vm23_vm2, %v1412_v26 }
  0x29   :  { %58 = vst.msk [vmem:[#allocation2 + $0x110] sm:$0xff] %vm23_vm2, %v1412_v26 }
  0x2a   :  { %59 = vst.msk [vmem:[#allocation2 + $0x118] sm:$0xff] %vm23_vm2, %v1412_v26 }
  0x2b   :  { %60 = vst.msk [vmem:[#allocation2 + $0x120] sm:$0xff] %vm23_vm2, %v1412_v26 }
  0x2c   :  { %61 = vst.msk [vmem:[#allocation2 + $0x128] sm:$0xff] %vm23_vm2, %v1412_v26 }
  0x2d   :  { %62 = vst.msk [vmem:[#allocation2 + $0x130] sm:$0xff] %vm23_vm2, %v1412_v26 }
  0x2e   :  { %63 = vst.msk [vmem:[#allocation2 + $0x138] sm:$0xff] %vm23_vm2, %v1412_v26  ;;  %v120_v54 = vld [vmem:[#allocation2 + $0x100] sm:$0xff] }
  0x2f   :  { %64 = vst.msk [vmem:[#allocation2 + $0x140] sm:$0xff] %vm23_vm2, %v1412_v26  ;;  %v121_v61 = vld [vmem:[#allocation2 + $0x108] sm:$0xff] }
  0x30   :  { %65 = vst.msk [vmem:[#allocation2 + $0x148] sm:$0xff] %vm23_vm2, %v1412_v26  ;;  %v122_v9 = vld [vmem:[#allocation2 + $0x110] sm:$0xff] }
  0x31   :  { %66 = vst.msk [vmem:[#allocation2 + $0x150] sm:$0xff] %vm23_vm2, %v1412_v26 }
  0x32   :  { %67 = vst.msk [vmem:[#allocation2 + $0x158] sm:$0xff] %vm23_vm2, %v1412_v26 }
  0x33   :  { %68 = vst.msk [vmem:[#allocation2 + $0x160] sm:$0xff] %vm23_vm2, %v1412_v26 }
  0x34   :  { %69 = vst.msk [vmem:[#allocation2 + $0x168] sm:$0xff] %vm23_vm2, %v1412_v26 }
  0x35   :  { %70 = vst.msk [vmem:[#allocation2 + $0x170] sm:$0xff] %vm23_vm2, %v1412_v26 }
  0x36   :  { %1316 = vmatmul.msk.bf16.gmra.mxu0 %vm377_vm1, %v1348_v14  ;;  %1324 = vmatmul.msk.bf16.gmra.mxu1 %vm377_vm1, %v1356_v15  ;;  %71 = vst.msk [vmem:[#allocation2 + $0x178] sm:$0xff] %vm23_vm2, %v1412_v26  ;;  %v859_v14 = vld [vmem:[%s2132_s2 + $0x80] sm:$0xff] }
  0x37   :  { %1332 = vmatmul.msk.bf16.gmra.mxu2 %vm377_vm1, %v1364_v16  ;;  %1340 = vmatmul.msk.bf16.gmra.mxu3 %vm377_vm1, %v1372_v17  ;;  %72 = vst.msk [vmem:[#allocation2 + $0x180] sm:$0xff] %vm23_vm2, %v1412_v26  ;;  %v107_v16 = vld [vmem:[#allocation2 + $0x98] sm:$0xff]  ;;  %v875_v17 = vld [vmem:[%s2132_s2 + $0x100] sm:$0xff] }
  0x38   :  { %73 = vst.msk [vmem:[#allocation2 + $0x188] sm:$0xff] %vm23_vm2, %v1412_v26 }
  0x39   :  { %74 = vst.msk [vmem:[#allocation2 + $0x190] sm:$0xff] %vm23_vm2, %v1412_v26 }
  0x3a   :  { %75 = vst.msk [vmem:[#allocation2 + $0x198] sm:$0xff] %vm23_vm2, %v1412_v26 }
  0x3b   :  { %76 = vst.msk [vmem:[#allocation2 + $0x1a0] sm:$0xff] %vm23_vm2, %v1412_v26 }
  0x3c   :  { %77 = vst.msk [vmem:[#allocation2 + $0x1a8] sm:$0xff] %vm23_vm2, %v1412_v26 }
  0x3d   :  { %78 = vst.msk [vmem:[#allocation2 + $0x1b0] sm:$0xff] %vm23_vm2, %v1412_v26 }
  0x3e   :  { %79 = vst.msk [vmem:[#allocation2 + $0x1b8] sm:$0xff] %vm23_vm2, %v1412_v26  ;;  %v136_v55 = vld [vmem:[#allocation2 + $0x180] sm:$0xff] }
  0x3f   :  { %80 = vst.msk [vmem:[#allocation2 + $0x1c0] sm:$0xff] %vm23_vm2, %v1412_v26  ;;  %v137_v63 = vld [vmem:[#allocation2 + $0x188] sm:$0xff] }
  0x40   :  { %81 = vst.msk [vmem:[#allocation2 + $0x1c8] sm:$0xff] %vm23_vm2, %v1412_v26  ;;  %v138_v11 = vld [vmem:[#allocation2 + $0x190] sm:$0xff] }
  0x41   :  { %82 = vst.msk [vmem:[#allocation2 + $0x1d0] sm:$0xff] %vm23_vm2, %v1412_v26 }
  0x42   :  { %83 = vst.msk [vmem:[#allocation2 + $0x1d8] sm:$0xff] %vm23_vm2, %v1412_v26 }
  0x43   :  { %84 = vst.msk [vmem:[#allocation2 + $0x1e0] sm:$0xff] %vm23_vm2, %v1412_v26 }
  0x44   :  { %85 = vst.msk [vmem:[#allocation2 + $0x1e8] sm:$0xff] %vm23_vm2, %v1412_v26 }
  0x45   :  { %86 = vst.msk [vmem:[#allocation2 + $0x1f0] sm:$0xff] %vm23_vm2, %v1412_v26 }
  0x46   :  { %1317 = vmatmul.msk.bf16.gmra.mxu0 %vm377_vm1, %v1349_v18  ;;  %1325 = vmatmul.msk.bf16.gmra.mxu1 %vm377_vm1, %v1357_v19  ;;  %87 = vst.msk [vmem:[#allocation2 + $0x1f8] sm:$0xff] %vm23_vm2, %v1412_v26  ;;  %v123_v19 = vld [vmem:[#allocation2 + $0x118] sm:$0xff] }
  0x47   :  { %1333 = vmatmul.msk.bf16.gmra.mxu2 %vm377_vm1, %v1365_v20  ;;  %1341 = vmatmul.msk.bf16.gmra.mxu3 %vm377_vm1, %v1373_v21  ;;  %v891_v21 = vld [vmem:[%s2132_s2 + $0x180] sm:$0xff] }
  0x56   :  { %1318 = vmatmul.msk.bf16.gmra.mxu0 %vm377_vm1, %v1350_v22  ;;  %1326 = vmatmul.msk.bf16.gmra.mxu1 %vm377_vm1, %v1358_v23 }
  0x57   :  { %1334 = vmatmul.msk.bf16.gmra.mxu2 %vm377_vm1, %v1366_v24  ;;  %1342 = vmatmul.msk.bf16.gmra.mxu3 %vm377_vm1, %v1374_v25  ;;  %v844_v25 = vld [vmem:[%s2132_s2 + $0x8] sm:$0xff] }
  0x66   :  { %1319 = vmatmul.msk.bf16.gmra.mxu0 %vm377_vm1, %v1351_v27  ;;  %1327 = vmatmul.msk.bf16.gmra.mxu1 %vm377_vm1, %v1359_v28 }
  0x67   :  { %1335 = vmatmul.msk.bf16.gmra.mxu2 %vm377_vm1, %v1367_v29  ;;  %1343 = vmatmul.msk.bf16.gmra.mxu3 %vm377_vm1, %v1375_v30 }
  0x76   :  { %1320 = vmatmul.msk.bf16.gmra.mxu0 %vm377_vm1, %v1352_v31  ;;  %1328 = vmatmul.msk.bf16.gmra.mxu1 %vm377_vm1, %v1360_v32  ;;  %v860_v31 = vld [vmem:[%s2132_s2 + $0x88] sm:$0xff] }
  0x77   :  { %1336 = vmatmul.msk.bf16.gmra.mxu2 %vm377_vm1, %v1368_v33  ;;  %1344 = vmatmul.msk.bf16.gmra.mxu3 %vm377_vm1, %v1376_v34 }
  0x83   :  { %v487_v36 = vpop.f32.mrf.mxu0  ;;  %v527_v37 = vpop.f32.mrf.mxu1 }
  0x84   :  { %v647_v38 = vadd.f32 %v487_v36, %v88_v35  ;;  %v663_v56 = vadd.f32 %v527_v37, %v104_v51 }
  0x86   :  { %712 = vst.msk [vmem:[#allocation2] sm:$0xff] %vm23_vm2, %v647_v38  ;;  %v876_v38 = vld [vmem:[%s2132_s2 + $0x108] sm:$0xff] }
  0x87   :  { %728 = vst.msk [vmem:[#allocation2 + $0x80] sm:$0xff] %vm23_vm2, %v663_v56 }
  0x8a   :  { %v567_v39 = vpop.f32.mrf.mxu2  ;;  %v607_v40 = vpop.f32.mrf.mxu3 }
  0x8b   :  { %v489_v42 = vpop.f32.mrf.mxu0  ;;  %v529_v43 = vpop.f32.mrf.mxu1  ;;  %v679_v58 = vadd.f32 %v567_v39, %v120_v54  ;;  %v695_v60 = vadd.f32 %v607_v40, %v136_v55 }
  0x8c   :  { %v648_v62 = vadd.f32 %v489_v42, %v89_v57  ;;  %v664_v0 = vadd.f32 %v529_v43, %v105_v59  ;;  %v892_v42 = vld [vmem:[%s2132_s2 + $0x188] sm:$0xff] }
  0x8d   :  { %v779_v45 = vld [vmem:[#allocation2] sm:$0xff]  ;;  %744 = vst.msk [vmem:[#allocation2 + $0x100] sm:$0xff] %vm23_vm2, %v679_v58  ;;  %v877_v58 = vld [vmem:[%s2132_s2 + $0x110] sm:$0xff] }
  0x8e   :  { %v907_v46 = vadd.f32 %v843_v41, %v779_v45  ;;  %760 = vst.msk [vmem:[#allocation2 + $0x180] sm:$0xff] %vm23_vm2, %v695_v60  ;;  %v795_v20 = vld [vmem:[#allocation2 + $0x80] sm:$0xff] }
  0x8f   :  { %713 = vst.msk [vmem:[#allocation2 + $0x8] sm:$0xff] %vm23_vm2, %v648_v62  ;;  %v923_v23 = vadd.f32 %v859_v14, %v795_v20 }
  0x90   :  { %v975_v47 = vadd.f32 %v1681_v44, %v907_v46  ;;  %729 = vst.msk [vmem:[#allocation2 + $0x88] sm:$0xff] %vm23_vm2, %v664_v0 }
  0x91   :  { %v991_v35 = vadd.f32 %v1681_v44, %v923_v23 }
  0x92   :  { %v1039_v48 = vmax.f32 %v975_v47, 0.0  ;;  %v569_v49 = vpop.f32.mrf.mxu2  ;;  %v609_v50 = vpop.f32.mrf.mxu3 }
  0x93   :  { %v492_v52 = vpop.f32.mrf.mxu0  ;;  %v532_v53 = vpop.f32.mrf.mxu1  ;;  %v680_v4 = vadd.f32 %v569_v49, %v121_v61  ;;  %v696_v8 = vadd.f32 %v609_v50, %v137_v63  ;;  %v1055_v43 = vmax.f32 %v991_v35, 0.0  ;;  %v893_v63 = vld [vmem:[%s2132_s2 + $0x190] sm:$0xff] }
  0x94   :  { %1103 = vst.msk [vmem:[#allocation3] sm:$0xff] %vm23_vm2, %v1039_v48  ;;  %v649_v10 = vadd.f32 %v492_v52, %v90_v1  ;;  %v665_v12 = vadd.f32 %v532_v53, %v106_v5  ;;  %v811_v24 = vld [vmem:[#allocation2 + $0x100] sm:$0xff]  ;;  %v845_v48 = vld [vmem:[%s2132_s2 + $0x10] sm:$0xff] }
  0x95   :  { %745 = vst.msk [vmem:[#allocation2 + $0x108] sm:$0xff] %vm23_vm2, %v680_v4  ;;  %v939_v29 = vadd.f32 %v875_v17, %v811_v24  ;;  %v827_v30 = vld [vmem:[#allocation2 + $0x180] sm:$0xff]  ;;  %v861_v53 = vld [vmem:[%s2132_s2 + $0x90] sm:$0xff]  ;;  %v846_v4 = vld [vmem:[%s2132_s2 + $0x18] sm:$0xff] }
  0x96   :  { %761 = vst.msk [vmem:[#allocation2 + $0x188] sm:$0xff] %vm23_vm2, %v696_v8  ;;  %v955_v36 = vadd.f32 %v891_v21, %v827_v30  ;;  %v780_v37 = vld [vmem:[#allocation2 + $0x8] sm:$0xff] }
  0x97   :  { %714 = vst.msk [vmem:[#allocation2 + $0x10] sm:$0xff] %vm23_vm2, %v649_v10  ;;  %v1007_v39 = vadd.f32 %v1681_v44, %v939_v29  ;;  %v908_v40 = vadd.f32 %v844_v25, %v780_v37  ;;  %v796_v41 = vld [vmem:[#allocation2 + $0x88] sm:$0xff] }
  0x98   :  { %730 = vst.msk [vmem:[#allocation2 + $0x90] sm:$0xff] %vm23_vm2, %v665_v12  ;;  %v1023_v45 = vadd.f32 %v1681_v44, %v955_v36  ;;  %v924_v46 = vadd.f32 %v860_v31, %v796_v41  ;;  %v139_v31 = vld [vmem:[#allocation2 + $0x198] sm:$0xff]  ;;  %v92_v36 = vld [vmem:[#allocation2 + $0x20] sm:$0xff] }
  0x99   :  { %v1071_v49 = vmax.f32 %v1007_v39, 0.0  ;;  %v976_v50 = vadd.f32 %v1681_v44, %v908_v40  ;;  %1119 = vst.msk [vmem:[#allocation3 + $0x80] sm:$0xff] %vm23_vm2, %v1055_v43  ;;  %v108_v39 = vld [vmem:[#allocation2 + $0xa0] sm:$0xff] }
  0x9a   :  { %v572_v2 = vpop.f32.mrf.mxu2  ;;  %v612_v3 = vpop.f32.mrf.mxu3  ;;  %v1087_v54 = vmax.f32 %v1023_v45, 0.0  ;;  %v992_v55 = vadd.f32 %v1681_v44, %v924_v46 }
  0x9b   :  { %v494_v6 = vpop.f32.mrf.mxu0  ;;  %v534_v7 = vpop.f32.mrf.mxu1  ;;  %v681_v15 = vadd.f32 %v572_v2, %v122_v9  ;;  %v697_v18 = vadd.f32 %v612_v3, %v138_v11  ;;  %1135 = vst.msk [vmem:[#allocation3 + $0x100] sm:$0xff] %vm23_vm2, %v1071_v49  ;;  %v1040_v59 = vmax.f32 %v976_v50, 0.0  ;;  %v862_v11 = vld [vmem:[%s2132_s2 + $0x98] sm:$0xff] }
  0x9c   :  { %v650_v22 = vadd.f32 %v494_v6, %v91_v13  ;;  %v666_v26 = vadd.f32 %v534_v7, %v107_v16  ;;  %v812_v47 = vld [vmem:[#allocation2 + $0x108] sm:$0xff]  ;;  %1151 = vst.msk [vmem:[#allocation3 + $0x180] sm:$0xff] %vm23_vm2, %v1087_v54  ;;  %v1056_v0 = vmax.f32 %v992_v55, 0.0 }
  0x9d   :  { %746 = vst.msk [vmem:[#allocation2 + $0x110] sm:$0xff] %vm23_vm2, %v681_v15  ;;  %v940_v51 = vadd.f32 %v876_v38, %v812_v47  ;;  %v828_v52 = vld [vmem:[#allocation2 + $0x188] sm:$0xff] }
  0x9e   :  { %762 = vst.msk [vmem:[#allocation2 + $0x190] sm:$0xff] %vm23_vm2, %v697_v18  ;;  %v956_v56 = vadd.f32 %v892_v42, %v828_v52  ;;  %v781_v57 = vld [vmem:[#allocation2 + $0x10] sm:$0xff]  ;;  %v878_v18 = vld [vmem:[%s2132_s2 + $0x118] sm:$0xff]  ;;  %v124_v42 = vld [vmem:[#allocation2 + $0x120] sm:$0xff] }
  0x9f   :  { %715 = vst.msk [vmem:[#allocation2 + $0x18] sm:$0xff] %vm23_vm2, %v650_v22  ;;  %v1008_v60 = vadd.f32 %v1681_v44, %v940_v51  ;;  %v909_v61 = vadd.f32 %v845_v48, %v781_v57  ;;  %v797_v62 = vld [vmem:[#allocation2 + $0x90] sm:$0xff]  ;;  %v140_v48 = vld [vmem:[#allocation2 + $0x1a0] sm:$0xff]  ;;  %v93_v52 = vld [vmem:[#allocation2 + $0x28] sm:$0xff] }
  0xa0   :  { %731 = vst.msk [vmem:[#allocation2 + $0x98] sm:$0xff] %vm23_vm2, %v666_v26  ;;  %v1024_v1 = vadd.f32 %v1681_v44, %v956_v56  ;;  %v925_v2 = vadd.f32 %v861_v53, %v797_v62  ;;  %v125_v55 = vld [vmem:[#allocation2 + $0x128] sm:$0xff] }
  0xa1   :  { %1104 = vst.msk [vmem:[#allocation3 + $0x8] sm:$0xff] %vm23_vm2, %v1040_v59  ;;  %v1072_v7 = vmax.f32 %v1008_v60, 0.0  ;;  %v977_v8 = vadd.f32 %v1681_v44, %v909_v61  ;;  %v110_v59 = vld [vmem:[#allocation2 + $0xb0] sm:$0xff] }
  0xa2   :  { %v574_v27 = vpop.f32.mrf.mxu2  ;;  %v1732_v28 = vpop.f32.mrf.mxu3  ;;  %1120 = vst.msk [vmem:[#allocation3 + $0x88] sm:$0xff] %vm23_vm2, %v1056_v0  ;;  %v1088_v14 = vmax.f32 %v1024_v1, 0.0  ;;  %v993_v15 = vadd.f32 %v1681_v44, %v925_v2  ;;  %v126_v61 = vld [vmem:[#allocation2 + $0x130] sm:$0xff]  ;;  %v894_v0 = vld [vmem:[%s2132_s2 + $0x198] sm:$0xff] }
  0xa3   :  { %v682_v32 = vadd.f32 %v574_v27, %v123_v19  ;;  %v1738_v33 = vpop.f32.mrf.mxu0  ;;  %v1740_v34 = vpop.f32.mrf.mxu1  ;;  %1136 = vst.msk [vmem:[#allocation3 + $0x108] sm:$0xff] %vm23_vm2, %v1072_v7  ;;  %v1041_v19 = vmax.f32 %v977_v8, 0.0  ;;  %v698_v41 = vadd.f32 %v1732_v28, %v139_v31  ;;  %v109_v28 = vld [vmem:[#allocation2 + $0xa8] sm:$0xff]  ;;  %v142_v2 = vld [vmem:[#allocation2 + $0x1b0] sm:$0xff]  ;;  %v95_v7 = vld [vmem:[#allocation2 + $0x38] sm:$0xff] }
  0xa4   :  { %v813_v3 = vld [vmem:[#allocation2 + $0x110] sm:$0xff]  ;;  %1152 = vst.msk [vmem:[#allocation3 + $0x188] sm:$0xff] %vm23_vm2, %v1088_v14  ;;  %v1057_v23 = vmax.f32 %v993_v15, 0.0  ;;  %v651_v47 = vadd.f32 %v1738_v33, %v92_v36  ;;  %v667_v51 = vadd.f32 %v1740_v34, %v108_v39  ;;  %v141_v33 = vld [vmem:[#allocation2 + $0x1a8] sm:$0xff] }
  0xa5   :  { %747 = vst.msk [vmem:[#allocation2 + $0x118] sm:$0xff] %vm23_vm2, %v682_v32  ;;  %v941_v9 = vadd.f32 %v877_v58, %v813_v3  ;;  %v829_v10 = vld [vmem:[#allocation2 + $0x190] sm:$0xff] }
  0xa6   :  { %v957_v16 = vadd.f32 %v893_v63, %v829_v10  ;;  %v782_v17 = vld [vmem:[#allocation2 + $0x18] sm:$0xff]  ;;  %1105 = vst.msk [vmem:[#allocation3 + $0x10] sm:$0xff] %vm23_vm2, %v1041_v19  ;;  %v94_v58 = vld [vmem:[#allocation2 + $0x30] sm:$0xff] }
  0xa7   :  { %v1009_v20 = vadd.f32 %v1681_v44, %v941_v9  ;;  %v910_v21 = vadd.f32 %v846_v4, %v782_v17  ;;  %v798_v22 = vld [vmem:[#allocation2 + $0x98] sm:$0xff]  ;;  %1121 = vst.msk [vmem:[#allocation3 + $0x90] sm:$0xff] %vm23_vm2, %v1057_v23  ;;  %v863_v9 = vld [vmem:[%s2132_s2 + $0xa0] sm:$0xff] }
  0xa8   :  { %v1025_v24 = vadd.f32 %v1681_v44, %v957_v16  ;;  %v926_v25 = vadd.f32 %v862_v11, %v798_v22  ;;  %763 = vst.msk [vmem:[#allocation2 + $0x198] sm:$0xff] %vm23_vm2, %v698_v41  ;;  %v895_v17 = vld [vmem:[%s2132_s2 + $0x1a0] sm:$0xff]  ;;  %v848_v22 = vld [vmem:[%s2132_s2 + $0x28] sm:$0xff] }
  0xa9   :  { %v1073_v27 = vmax.f32 %v1009_v20, 0.0  ;;  %v978_v29 = vadd.f32 %v1681_v44, %v910_v21  ;;  %716 = vst.msk [vmem:[#allocation2 + $0x20] sm:$0xff] %vm23_vm2, %v651_v47  ;;  %v896_v41 = vld [vmem:[%s2132_s2 + $0x1a8] sm:$0xff] }
  0xaa   :  { %v577_v5 = vpop.f32.mrf.mxu2  ;;  %v617_v6 = vpop.f32.mrf.mxu3  ;;  %v1089_v32 = vmax.f32 %v1025_v24, 0.0  ;;  %v994_v35 = vadd.f32 %v1681_v44, %v926_v25  ;;  %732 = vst.msk [vmem:[#allocation2 + $0xa0] sm:$0xff] %vm23_vm2, %v667_v51 }
  0xab   :  { %v499_v12 = vpop.f32.mrf.mxu0  ;;  %v539_v13 = vpop.f32.mrf.mxu1  ;;  %1137 = vst.msk [vmem:[#allocation3 + $0x110] sm:$0xff] %vm23_vm2, %v1073_v27  ;;  %v1042_v37 = vmax.f32 %v978_v29, 0.0  ;;  %v683_v53 = vadd.f32 %v577_v5, %v124_v42  ;;  %v699_v54 = vadd.f32 %v617_v6, %v140_v48  ;;  %v847_v5 = vld [vmem:[%s2132_s2 + $0x20] sm:$0xff] }
  0xac   :  { %v814_v26 = vld [vmem:[#allocation2 + $0x118] sm:$0xff]  ;;  %1153 = vst.msk [vmem:[#allocation3 + $0x190] sm:$0xff] %vm23_vm2, %v1089_v32  ;;  %v1058_v40 = vmax.f32 %v994_v35, 0.0  ;;  %v652_v56 = vadd.f32 %v499_v12, %v93_v52  ;;  %v668_v57 = vadd.f32 %v539_v13, %v109_v28  ;;  %v879_v13 = vld [vmem:[%s2132_s2 + $0x120] sm:$0xff]  ;;  %v880_v32 = vld [vmem:[%s2132_s2 + $0x128] sm:$0xff] }
  0xad   :  { %v942_v30 = vadd.f32 %v878_v18, %v814_v26  ;;  %1106 = vst.msk [vmem:[#allocation3 + $0x18] sm:$0xff] %vm23_vm2, %v1042_v37  ;;  %v864_v26 = vld [vmem:[%s2132_s2 + $0xa8] sm:$0xff]  ;;  %v865_v28 = vld [vmem:[%s2132_s2 + $0xb0] sm:$0xff] }
  0xae   :  { %1122 = vst.msk [vmem:[#allocation3 + $0x98] sm:$0xff] %vm23_vm2, %v1058_v40 }
  0xaf   :  { %v1010_v38 = vadd.f32 %v1681_v44, %v942_v30  ;;  %748 = vst.msk [vmem:[#allocation2 + $0x120] sm:$0xff] %vm23_vm2, %v683_v53  ;;  %v830_v8 = vld [vmem:[#allocation2 + $0x198] sm:$0xff] }
  0xb0   :  { %764 = vst.msk [vmem:[#allocation2 + $0x1a0] sm:$0xff] %vm23_vm2, %v699_v54  ;;  %v958_v11 = vadd.f32 %v894_v0, %v830_v8  ;;  %v783_v12 = vld [vmem:[#allocation2 + $0x20] sm:$0xff] }
  0xb1   :  { %v1074_v46 = vmax.f32 %v1010_v38, 0.0  ;;  %717 = vst.msk [vmem:[#allocation2 + $0x28] sm:$0xff] %vm23_vm2, %v652_v56  ;;  %v911_v15 = vadd.f32 %v847_v5, %v783_v12  ;;  %v799_v16 = vld [vmem:[#allocation2 + $0xa0] sm:$0xff] }
  0xb2   :  { %v579_v43 = vpop.f32.mrf.mxu2  ;;  %v619_v45 = vpop.f32.mrf.mxu3  ;;  %733 = vst.msk [vmem:[#allocation2 + $0xa8] sm:$0xff] %vm23_vm2, %v668_v57  ;;  %v1026_v19 = vadd.f32 %v1681_v44, %v958_v11  ;;  %v927_v20 = vadd.f32 %v863_v9, %v799_v16  ;;  %v881_v57 = vld [vmem:[%s2132_s2 + $0x130] sm:$0xff] }
  0xb3   :  { %v502_v49 = vpop.f32.mrf.mxu0  ;;  %v542_v50 = vpop.f32.mrf.mxu1  ;;  %1138 = vst.msk [vmem:[#allocation3 + $0x118] sm:$0xff] %vm23_vm2, %v1074_v46  ;;  %v684_v34 = vadd.f32 %v579_v43, %v125_v55  ;;  %v700_v60 = vadd.f32 %v619_v45, %v141_v33  ;;  %v979_v23 = vadd.f32 %v1681_v44, %v911_v15 }
  0xb4   :  { %v653_v1 = vadd.f32 %v502_v49, %v94_v58  ;;  %v669_v6 = vadd.f32 %v542_v50, %v110_v59  ;;  %v1090_v27 = vmax.f32 %v1026_v19, 0.0  ;;  %v995_v29 = vadd.f32 %v1681_v44, %v927_v20  ;;  %v849_v49 = vld [vmem:[%s2132_s2 + $0x30] sm:$0xff] }
  0xb5   :  { %749 = vst.msk [vmem:[#allocation2 + $0x128] sm:$0xff] %vm23_vm2, %v684_v34  ;;  %v1043_v37 = vmax.f32 %v979_v23, 0.0 }
  0xb6   :  { %765 = vst.msk [vmem:[#allocation2 + $0x1a8] sm:$0xff] %vm23_vm2, %v700_v60  ;;  %v815_v21 = vld [vmem:[#allocation2 + $0x120] sm:$0xff]  ;;  %v1059_v45 = vmax.f32 %v995_v29, 0.0 }
  0xb7   :  { %718 = vst.msk [vmem:[#allocation2 + $0x30] sm:$0xff] %vm23_vm2, %v653_v1  ;;  %v943_v24 = vadd.f32 %v879_v13, %v815_v21  ;;  %v831_v25 = vld [vmem:[#allocation2 + $0x1a0] sm:$0xff] }
  0xb8   :  { %734 = vst.msk [vmem:[#allocation2 + $0xb0] sm:$0xff] %vm23_vm2, %v669_v6  ;;  %v959_v30 = vadd.f32 %v895_v17, %v831_v25  ;;  %v784_v31 = vld [vmem:[#allocation2 + $0x28] sm:$0xff]  ;;  %v111_v17 = vld [vmem:[#allocation2 + $0xb8] sm:$0xff]  ;;  %v96_v29 = vld [vmem:[#allocation2 + $0x40] sm:$0xff] }
  0xb9   :  { %v1011_v38 = vadd.f32 %v1681_v44, %v943_v24  ;;  %v912_v39 = vadd.f32 %v848_v22, %v784_v31  ;;  %v800_v40 = vld [vmem:[#allocation2 + $0xa8] sm:$0xff]  ;;  %1154 = vst.msk [vmem:[#allocation3 + $0x198] sm:$0xff] %vm23_vm2, %v1090_v27  ;;  %v127_v22 = vld [vmem:[#allocation2 + $0x138] sm:$0xff] }
  0xba   :  { %v582_v62 = vpop.f32.mrf.mxu2  ;;  %v622_v63 = vpop.f32.mrf.mxu3  ;;  %v1027_v46 = vadd.f32 %v1681_v44, %v959_v30  ;;  %v928_v47 = vadd.f32 %v864_v26, %v800_v40  ;;  %1107 = vst.msk [vmem:[#allocation3 + $0x20] sm:$0xff] %vm23_vm2, %v1043_v37  ;;  %v143_v25 = vld [vmem:[#allocation2 + $0x1b8] sm:$0xff]  ;;  %v144_v40 = vld [vmem:[#allocation2 + $0x1c0] sm:$0xff] }
  0xbb   :  { %v504_v3 = vpop.f32.mrf.mxu0  ;;  %v1813_v4 = vpop.f32.mrf.mxu1  ;;  %v685_v10 = vadd.f32 %v582_v62, %v126_v61  ;;  %v701_v14 = vadd.f32 %v622_v63, %v142_v2  ;;  %v1075_v50 = vmax.f32 %v1011_v38, 0.0  ;;  %v980_v51 = vadd.f32 %v1681_v44, %v912_v39  ;;  %1123 = vst.msk [vmem:[#allocation3 + $0xa0] sm:$0xff] %vm23_vm2, %v1059_v45  ;;  %v897_v61 = vld [vmem:[%s2132_s2 + $0x1b0] sm:$0xff]  ;;  %v850_v2 = vld [vmem:[%s2132_s2 + $0x38] sm:$0xff]  ;;  %v128_v38 = vld [vmem:[#allocation2 + $0x140] sm:$0xff] }
  0xbc   :  { %v654_v18 = vadd.f32 %v504_v3, %v95_v7  ;;  %v816_v48 = vld [vmem:[#allocation2 + $0x128] sm:$0xff]  ;;  %v1091_v54 = vmax.f32 %v1027_v46, 0.0  ;;  %v996_v55 = vadd.f32 %v1681_v44, %v928_v47  ;;  %v670_v27 = vadd.f32 %v1813_v4, %v111_v17 }
  0xbd   :  { %750 = vst.msk [vmem:[#allocation2 + $0x130] sm:$0xff] %vm23_vm2, %v685_v10  ;;  %v944_v52 = vadd.f32 %v880_v32, %v816_v48  ;;  %v832_v53 = vld [vmem:[#allocation2 + $0x1a8] sm:$0xff]  ;;  %v1044_v58 = vmax.f32 %v980_v51, 0.0  ;;  %v112_v32 = vld [vmem:[#allocation2 + $0xc0] sm:$0xff] }
  0xbe   :  { %766 = vst.msk [vmem:[#allocation2 + $0x1b0] sm:$0xff] %vm23_vm2, %v701_v14  ;;  %v960_v56 = vadd.f32 %v896_v41, %v832_v53  ;;  %v785_v33 = vld [vmem:[#allocation2 + $0x30] sm:$0xff]  ;;  %v1060_v62 = vmax.f32 %v996_v55, 0.0  ;;  %v97_v41 = vld [vmem:[#allocation2 + $0x48] sm:$0xff]  ;;  %v866_v53 = vld [vmem:[%s2132_s2 + $0xb8] sm:$0xff] }
  0xbf   :  { %719 = vst.msk [vmem:[#allocation2 + $0x38] sm:$0xff] %vm23_vm2, %v654_v18  ;;  %v1012_v34 = vadd.f32 %v1681_v44, %v944_v52  ;;  %v913_v59 = vadd.f32 %v849_v49, %v785_v33  ;;  %v801_v60 = vld [vmem:[#allocation2 + $0xb0] sm:$0xff]  ;;  %v113_v47 = vld [vmem:[#allocation2 + $0xc8] sm:$0xff]  ;;  %v882_v55 = vld [vmem:[%s2132_s2 + $0x138] sm:$0xff] }
  0xc0   :  { %1139 = vst.msk [vmem:[#allocation3 + $0x120] sm:$0xff] %vm23_vm2, %v1075_v50  ;;  %v1028_v63 = vadd.f32 %v1681_v44, %v960_v56  ;;  %v929_v0 = vadd.f32 %v865_v28, %v801_v60  ;;  %v129_v50 = vld [vmem:[#allocation2 + $0x148] sm:$0xff]  ;;  %v98_v52 = vld [vmem:[#allocation2 + $0x50] sm:$0xff] }
  0xc1   :  { %1155 = vst.msk [vmem:[#allocation3 + $0x1a0] sm:$0xff] %vm23_vm2, %v1091_v54  ;;  %v1076_v3 = vmax.f32 %v1012_v34, 0.0  ;;  %v981_v5 = vadd.f32 %v1681_v44, %v913_v59  ;;  %v145_v51 = vld [vmem:[#allocation2 + $0x1c8] sm:$0xff]  ;;  %v114_v54 = vld [vmem:[#allocation2 + $0xd0] sm:$0xff] }
  0xc2   :  { %v1846_v35 = vpop.f32.mrf.mxu2  ;;  %v1848_v36 = vpop.f32.mrf.mxu3  ;;  %1108 = vst.msk [vmem:[#allocation3 + $0x28] sm:$0xff] %vm23_vm2, %v1044_v58  ;;  %v1092_v8 = vmax.f32 %v1028_v63, 0.0  ;;  %v997_v9 = vadd.f32 %v1681_v44, %v929_v0  ;;  %v130_v33 = vld [vmem:[#allocation2 + $0x150] sm:$0xff]  ;;  %v898_v58 = vld [vmem:[%s2132_s2 + $0x1b8] sm:$0xff] }
  0xc3   :  { %v1855_v42 = vpop.f32.mrf.mxu0  ;;  %v1857_v43 = vpop.f32.mrf.mxu1  ;;  %1124 = vst.msk [vmem:[#allocation3 + $0xa8] sm:$0xff] %vm23_vm2, %v1060_v62  ;;  %v1045_v14 = vmax.f32 %v981_v5, 0.0  ;;  %v686_v31 = vadd.f32 %v1846_v35, %v127_v22  ;;  %v702_v37 = vadd.f32 %v1848_v36, %v143_v25  ;;  %v868_v25 = vld [vmem:[%s2132_s2 + $0xc8] sm:$0xff] }
  0xc4   :  { %v817_v1 = vld [vmem:[#allocation2 + $0x130] sm:$0xff]  ;;  %1140 = vst.msk [vmem:[#allocation3 + $0x128] sm:$0xff] %vm23_vm2, %v1076_v3  ;;  %v1061_v20 = vmax.f32 %v997_v9, 0.0  ;;  %v655_v39 = vadd.f32 %v1855_v42, %v96_v29  ;;  %v671_v4 = vadd.f32 %v1857_v43, %v112_v32  ;;  %v867_v3 = vld [vmem:[%s2132_s2 + $0xc0] sm:$0xff] }
  0xc5   :  { %v945_v6 = vadd.f32 %v881_v57, %v817_v1  ;;  %v833_v7 = vld [vmem:[#allocation2 + $0x1b0] sm:$0xff]  ;;  %1156 = vst.msk [vmem:[#allocation3 + $0x1a8] sm:$0xff] %vm23_vm2, %v1092_v8 }
  0xc6   :  { %v961_v10 = vadd.f32 %v897_v61, %v833_v7  ;;  %v786_v11 = vld [vmem:[#allocation2 + $0x38] sm:$0xff]  ;;  %1109 = vst.msk [vmem:[#allocation3 + $0x30] sm:$0xff] %vm23_vm2, %v1045_v14  ;;  %v851_v61 = vld [vmem:[%s2132_s2 + $0x40] sm:$0xff] }
  0xc7   :  { %v1013_v15 = vadd.f32 %v1681_v44, %v945_v6  ;;  %v914_v16 = vadd.f32 %v850_v2, %v786_v11  ;;  %1125 = vst.msk [vmem:[#allocation3 + $0xb0] sm:$0xff] %vm23_vm2, %v1061_v20  ;;  %v899_v14 = vld [vmem:[%s2132_s2 + $0x1c0] sm:$0xff]  ;;  %v852_v20 = vld [vmem:[%s2132_s2 + $0x48] sm:$0xff] }
  0xc8   :  { %v1029_v21 = vadd.f32 %v1681_v44, %v961_v10  ;;  %735 = vst.msk [vmem:[#allocation2 + $0xb8] sm:$0xff] %vm23_vm2, %v670_v27  ;;  %v883_v10 = vld [vmem:[%s2132_s2 + $0x140] sm:$0xff] }
  0xc9   :  { %v1077_v23 = vmax.f32 %v1013_v15, 0.0  ;;  %v982_v24 = vadd.f32 %v1681_v44, %v914_v16  ;;  %751 = vst.msk [vmem:[#allocation2 + $0x138] sm:$0xff] %vm23_vm2, %v686_v31  ;;  %v884_v31 = vld [vmem:[%s2132_s2 + $0x148] sm:$0xff] }
  0xca   :  { %v587_v12 = vpop.f32.mrf.mxu2  ;;  %v627_v13 = vpop.f32.mrf.mxu3  ;;  %v1093_v26 = vmax.f32 %v1029_v21, 0.0  ;;  %767 = vst.msk [vmem:[#allocation2 + $0x1b8] sm:$0xff] %vm23_vm2, %v702_v37 }
  0xcb   :  { %v509_v18 = vpop.f32.mrf.mxu0  ;;  %v549_v19 = vpop.f32.mrf.mxu1  ;;  %1141 = vst.msk [vmem:[#allocation3 + $0x130] sm:$0xff] %vm23_vm2, %v1077_v23  ;;  %v1046_v30 = vmax.f32 %v982_v24, 0.0  ;;  %v687_v35 = vadd.f32 %v587_v12, %v128_v38  ;;  %v703_v36 = vadd.f32 %v627_v13, %v144_v40  ;;  %v900_v40 = vld [vmem:[%s2132_s2 + $0x1c8] sm:$0xff] }
  0xcc   :  { %1157 = vst.msk [vmem:[#allocation3 + $0x1b0] sm:$0xff] %vm23_vm2, %v1093_v26  ;;  %v656_v42 = vadd.f32 %v509_v18, %v97_v41  ;;  %v672_v43 = vadd.f32 %v549_v19, %v113_v47 }
  0xcd   :  { %1110 = vst.msk [vmem:[#allocation3 + $0x38] sm:$0xff] %vm23_vm2, %v1046_v30 }
  0xce   :  { %720 = vst.msk [vmem:[#allocation2 + $0x40] sm:$0xff] %vm23_vm2, %v655_v39 }
  0xcf   :  { %736 = vst.msk [vmem:[#allocation2 + $0xc0] sm:$0xff] %vm23_vm2, %v671_v4  ;;  %v802_v57 = vld [vmem:[#allocation2 + $0xb8] sm:$0xff] }
  0xd0   :  { %752 = vst.msk [vmem:[#allocation2 + $0x140] sm:$0xff] %vm23_vm2, %v687_v35  ;;  %v930_v59 = vadd.f32 %v866_v53, %v802_v57  ;;  %v818_v60 = vld [vmem:[#allocation2 + $0x138] sm:$0xff]  ;;  %v853_v35 = vld [vmem:[%s2132_s2 + $0x50] sm:$0xff] }
  0xd1   :  { %768 = vst.msk [vmem:[#allocation2 + $0x1c0] sm:$0xff] %vm23_vm2, %v703_v36  ;;  %v946_v1 = vadd.f32 %v882_v55, %v818_v60  ;;  %v834_v2 = vld [vmem:[#allocation2 + $0x1b8] sm:$0xff]  ;;  %v885_v55 = vld [vmem:[%s2132_s2 + $0x150] sm:$0xff] }
  0xd2   :  { %v589_v45 = vpop.f32.mrf.mxu2  ;;  %v629_v46 = vpop.f32.mrf.mxu3  ;;  %721 = vst.msk [vmem:[#allocation2 + $0x48] sm:$0xff] %vm23_vm2, %v656_v42  ;;  %v998_v7 = vadd.f32 %v1681_v44, %v930_v59  ;;  %v962_v8 = vadd.f32 %v898_v58, %v834_v2  ;;  %v146_v2 = vld [vmem:[#allocation2 + $0x1d0] sm:$0xff] }
  0xd3   :  { %v512_v48 = vpop.f32.mrf.mxu0  ;;  %v552_v49 = vpop.f32.mrf.mxu1  ;;  %v688_v28 = vadd.f32 %v589_v45, %v129_v50  ;;  %v704_v56 = vadd.f32 %v629_v46, %v145_v51  ;;  %737 = vst.msk [vmem:[#allocation2 + $0xc8] sm:$0xff] %vm23_vm2, %v672_v43  ;;  %v1014_v11 = vadd.f32 %v1681_v44, %v946_v1  ;;  %v869_v51 = vld [vmem:[%s2132_s2 + $0xd0] sm:$0xff] }
  0xd4   :  { %v657_v34 = vadd.f32 %v512_v48, %v98_v52  ;;  %v673_v62 = vadd.f32 %v552_v49, %v114_v54  ;;  %v1062_v16 = vmax.f32 %v998_v7, 0.0  ;;  %v1030_v17 = vadd.f32 %v1681_v44, %v962_v8  ;;  %v99_v8 = vld [vmem:[#allocation2 + $0x58] sm:$0xff] }
  0xd5   :  { %753 = vst.msk [vmem:[#allocation2 + $0x148] sm:$0xff] %vm23_vm2, %v688_v28  ;;  %v787_v9 = vld [vmem:[#allocation2 + $0x40] sm:$0xff]  ;;  %v1078_v21 = vmax.f32 %v1014_v11, 0.0  ;;  %v115_v11 = vld [vmem:[#allocation2 + $0xd8] sm:$0xff] }
  0xd6   :  { %769 = vst.msk [vmem:[#allocation2 + $0x1c8] sm:$0xff] %vm23_vm2, %v704_v56  ;;  %v915_v12 = vadd.f32 %v851_v61, %v787_v9  ;;  %v803_v13 = vld [vmem:[#allocation2 + $0xc0] sm:$0xff]  ;;  %v1094_v26 = vmax.f32 %v1030_v17, 0.0 }
  0xd7   :  { %722 = vst.msk [vmem:[#allocation2 + $0x50] sm:$0xff] %vm23_vm2, %v657_v34  ;;  %v931_v18 = vadd.f32 %v867_v3, %v803_v13  ;;  %v819_v19 = vld [vmem:[#allocation2 + $0x140] sm:$0xff] }
  0xd8   :  { %738 = vst.msk [vmem:[#allocation2 + $0xd0] sm:$0xff] %vm23_vm2, %v673_v62  ;;  %v983_v22 = vadd.f32 %v1681_v44, %v915_v12  ;;  %v947_v23 = vadd.f32 %v883_v10, %v819_v19  ;;  %v835_v24 = vld [vmem:[#allocation2 + $0x1c0] sm:$0xff] }
  0xd9   :  { %1126 = vst.msk [vmem:[#allocation3 + $0xb8] sm:$0xff] %vm23_vm2, %v1062_v16  ;;  %v999_v27 = vadd.f32 %v1681_v44, %v931_v18  ;;  %v963_v29 = vadd.f32 %v899_v14, %v835_v24  ;;  %v788_v30 = vld [vmem:[#allocation2 + $0x48] sm:$0xff]  ;;  %v131_v14 = vld [vmem:[#allocation2 + $0x158] sm:$0xff] }
  0xda   :  { %v592_v63 = vpop.f32.mrf.mxu2  ;;  %v1924_v0 = vpop.f32.mrf.mxu3  ;;  %1142 = vst.msk [vmem:[#allocation3 + $0x138] sm:$0xff] %vm23_vm2, %v1078_v21  ;;  %v1047_v32 = vmax.f32 %v983_v22, 0.0  ;;  %v1015_v37 = vadd.f32 %v1681_v44, %v947_v23  ;;  %v916_v38 = vadd.f32 %v852_v20, %v788_v30  ;;  %v804_v39 = vld [vmem:[#allocation2 + $0xc8] sm:$0xff]  ;;  %v147_v20 = vld [vmem:[#allocation2 + $0x1d8] sm:$0xff]  ;;  %v100_v22 = vld [vmem:[#allocation2 + $0x60] sm:$0xff] }
  0xdb   :  { %v689_v5 = vadd.f32 %v592_v63, %v130_v33  ;;  %v1930_v6 = vpop.f32.mrf.mxu0  ;;  %v1942_v15 = vpop.f32.mrf.mxu1  ;;  %1158 = vst.msk [vmem:[#allocation3 + $0x1b8] sm:$0xff] %vm23_vm2, %v1094_v26  ;;  %v1063_v4 = vmax.f32 %v999_v27, 0.0  ;;  %v1031_v41 = vadd.f32 %v1681_v44, %v963_v29  ;;  %v932_v45 = vadd.f32 %v868_v25, %v804_v39  ;;  %v116_v25 = vld [vmem:[#allocation2 + $0xe0] sm:$0xff]  ;;  %v101_v30 = vld [vmem:[#allocation2 + $0x68] sm:$0xff] }
  0xdc   :  { %v820_v46 = vld [vmem:[#allocation2 + $0x148] sm:$0xff]  ;;  %1111 = vst.msk [vmem:[#allocation3 + $0x40] sm:$0xff] %vm23_vm2, %v1047_v32  ;;  %v1079_v49 = vmax.f32 %v1015_v37, 0.0  ;;  %v984_v36 = vadd.f32 %v1681_v44, %v916_v38  ;;  %v705_v13 = vadd.f32 %v1924_v0, %v146_v2  ;;  %v658_v19 = vadd.f32 %v1930_v6, %v99_v8  ;;  %v132_v26 = vld [vmem:[#allocation2 + $0x160] sm:$0xff] }
  0xdd   :  { %754 = vst.msk [vmem:[#allocation2 + $0x150] sm:$0xff] %vm23_vm2, %v689_v5  ;;  %v948_v50 = vadd.f32 %v884_v31, %v820_v46  ;;  %v836_v42 = vld [vmem:[#allocation2 + $0x1c8] sm:$0xff]  ;;  %v1095_v52 = vmax.f32 %v1031_v41, 0.0  ;;  %v1000_v53 = vadd.f32 %v1681_v44, %v932_v45  ;;  %v674_v21 = vadd.f32 %v1942_v15, %v115_v11  ;;  %v148_v29 = vld [vmem:[#allocation2 + $0x1e0] sm:$0xff]  ;;  %v854_v46 = vld [vmem:[%s2132_s2 + $0x58] sm:$0xff] }
  0xde   :  { %1127 = vst.msk [vmem:[#allocation3 + $0xc0] sm:$0xff] %vm23_vm2, %v1063_v4  ;;  %v964_v28 = vadd.f32 %v900_v40, %v836_v42  ;;  %v789_v54 = vld [vmem:[#allocation2 + $0x50] sm:$0xff]  ;;  %v1048_v56 = vmax.f32 %v984_v36, 0.0  ;;  %v117_v31 = vld [vmem:[#allocation2 + $0xe8] sm:$0xff] }
  0xdf   :  { %1143 = vst.msk [vmem:[#allocation3 + $0x140] sm:$0xff] %vm23_vm2, %v1079_v49  ;;  %v1016_v33 = vadd.f32 %v1681_v44, %v948_v50  ;;  %v917_v57 = vadd.f32 %v853_v35, %v789_v54  ;;  %v805_v58 = vld [vmem:[#allocation2 + $0xd0] sm:$0xff]  ;;  %v1064_v34 = vmax.f32 %v1000_v53, 0.0  ;;  %v133_v38 = vld [vmem:[#allocation2 + $0x168] sm:$0xff]  ;;  %v870_v49 = vld [vmem:[%s2132_s2 + $0xd8] sm:$0xff] }
  0xe0   :  { %1159 = vst.msk [vmem:[#allocation3 + $0x1c0] sm:$0xff] %vm23_vm2, %v1095_v52  ;;  %v1032_v59 = vadd.f32 %v1681_v44, %v964_v28  ;;  %v933_v60 = vadd.f32 %v869_v51, %v805_v58  ;;  %v901_v40 = vld [vmem:[%s2132_s2 + $0x1d0] sm:$0xff]  ;;  %v149_v41 = vld [vmem:[#allocation2 + $0x1e8] sm:$0xff]  ;;  %v886_v51 = vld [vmem:[%s2132_s2 + $0x158] sm:$0xff] }
  0xe1   :  { %1112 = vst.msk [vmem:[#allocation3 + $0x48] sm:$0xff] %vm23_vm2, %v1048_v56  ;;  %v1080_v62 = vmax.f32 %v1016_v33, 0.0  ;;  %v985_v63 = vadd.f32 %v1681_v44, %v917_v57  ;;  %v902_v54 = vld [vmem:[%s2132_s2 + $0x1d8] sm:$0xff]  ;;  %v855_v58 = vld [vmem:[%s2132_s2 + $0x60] sm:$0xff] }
  0xe2   :  { %v594_v47 = vpop.f32.mrf.mxu2  ;;  %v634_v48 = vpop.f32.mrf.mxu3  ;;  %1128 = vst.msk [vmem:[#allocation3 + $0xc8] sm:$0xff] %vm23_vm2, %v1064_v34  ;;  %v1096_v5 = vmax.f32 %v1032_v59, 0.0  ;;  %v1001_v7 = vadd.f32 %v1681_v44, %v933_v60 }
  0xe3   :  { %v517_v43 = vpop.f32.mrf.mxu0  ;;  %v557_v3 = vpop.f32.mrf.mxu1  ;;  %1144 = vst.msk [vmem:[#allocation3 + $0x148] sm:$0xff] %vm23_vm2, %v1080_v62  ;;  %v1049_v9 = vmax.f32 %v985_v63, 0.0  ;;  %v690_v24 = vadd.f32 %v594_v47, %v131_v14  ;;  %v706_v0 = vadd.f32 %v634_v48, %v147_v20  ;;  %v102_v47 = vld [vmem:[#allocation2 + $0x70] sm:$0xff] }
  0xe4   :  { %v821_v61 = vld [vmem:[#allocation2 + $0x150] sm:$0xff]  ;;  %1160 = vst.msk [vmem:[#allocation3 + $0x1c8] sm:$0xff] %vm23_vm2, %v1096_v5  ;;  %v1065_v12 = vmax.f32 %v1001_v7, 0.0  ;;  %v659_v27 = vadd.f32 %v517_v43, %v100_v22  ;;  %v675_v6 = vadd.f32 %v557_v3, %v116_v25  ;;  %v887_v3 = vld [vmem:[%s2132_s2 + $0x160] sm:$0xff] }
  0xe5   :  { %v949_v1 = vadd.f32 %v885_v55, %v821_v61  ;;  %1113 = vst.msk [vmem:[#allocation3 + $0x50] sm:$0xff] %vm23_vm2, %v1049_v9  ;;  %v871_v61 = vld [vmem:[%s2132_s2 + $0xe0] sm:$0xff] }
  0xe6   :  { %1129 = vst.msk [vmem:[#allocation3 + $0xd0] sm:$0xff] %vm23_vm2, %v1065_v12  ;;  %v2039_v7 = vld [vmem:[%s2133_s3] ss:$0 sm:$0xff] }
  0xe7   :  { %v1017_v10 = vadd.f32 %v1681_v44, %v949_v1  ;;  %770 = vst.msk [vmem:[#allocation2 + $0x1d0] sm:$0xff] %vm23_vm2, %v705_v13 }
  0xe8   :  { %723 = vst.msk [vmem:[#allocation2 + $0x58] sm:$0xff] %vm23_vm2, %v658_v19 }
  0xe9   :  { %v1081_v18 = vmax.f32 %v1017_v10, 0.0  ;;  %739 = vst.msk [vmem:[#allocation2 + $0xd8] sm:$0xff] %vm23_vm2, %v674_v21  ;;  %v872_v21 = vld [vmem:[%s2132_s2 + $0xe8] sm:$0xff] }
  0xea   :  { %v597_v16 = vpop.f32.mrf.mxu2  ;;  %v637_v17 = vpop.f32.mrf.mxu3  ;;  %755 = vst.msk [vmem:[#allocation2 + $0x158] sm:$0xff] %vm23_vm2, %v690_v24 }
  0xeb   :  { %v519_v23 = vpop.f32.mrf.mxu0  ;;  %1145 = vst.msk [vmem:[#allocation3 + $0x150] sm:$0xff] %vm23_vm2, %v1081_v18  ;;  %v691_v15 = vadd.f32 %v597_v16, %v132_v26  ;;  %v559_v32 = vpop.f32.mrf.mxu1  ;;  %v707_v37 = vadd.f32 %v637_v17, %v148_v29  ;;  %v856_v16 = vld [vmem:[%s2132_s2 + $0x68] sm:$0xff] }
  0xec   :  { %771 = vst.msk [vmem:[#allocation2 + $0x1d8] sm:$0xff] %vm23_vm2, %v706_v0  ;;  %v660_v4 = vadd.f32 %v519_v23, %v101_v30  ;;  %v676_v35 = vadd.f32 %v559_v32, %v117_v31  ;;  %v888_v26 = vld [vmem:[%s2132_s2 + $0x168] sm:$0xff] }
  0xed   :  { %724 = vst.msk [vmem:[#allocation2 + $0x60] sm:$0xff] %vm23_vm2, %v659_v27  ;;  %v904_v31 = vld [vmem:[%s2132_s2 + $0x1e8] sm:$0xff] }
  0xee   :  { %740 = vst.msk [vmem:[#allocation2 + $0xe0] sm:$0xff] %vm23_vm2, %v675_v6  ;;  %v837_v48 = vld [vmem:[#allocation2 + $0x1d0] sm:$0xff] }
  0xef   :  { %756 = vst.msk [vmem:[#allocation2 + $0x160] sm:$0xff] %vm23_vm2, %v691_v15  ;;  %v965_v50 = vadd.f32 %v901_v40, %v837_v48  ;;  %v790_v42 = vld [vmem:[#allocation2 + $0x58] sm:$0xff] }
  0xf0   :  { %772 = vst.msk [vmem:[#allocation2 + $0x1e0] sm:$0xff] %vm23_vm2, %v707_v37  ;;  %v918_v53 = vadd.f32 %v854_v46, %v790_v42  ;;  %v806_v28 = vld [vmem:[#allocation2 + $0xd8] sm:$0xff] }
  0xf1   :  { %725 = vst.msk [vmem:[#allocation2 + $0x68] sm:$0xff] %vm23_vm2, %v660_v4  ;;  %v1033_v56 = vadd.f32 %v1681_v44, %v965_v50  ;;  %v934_v33 = vadd.f32 %v870_v49, %v806_v28  ;;  %v822_v57 = vld [vmem:[#allocation2 + $0x158] sm:$0xff]  ;;  %v857_v4 = vld [vmem:[%s2132_s2 + $0x70] sm:$0xff] }
  0xf2   :  { %v599_v39 = vpop.f32.mrf.mxu2  ;;  %v639_v45 = vpop.f32.mrf.mxu3  ;;  %741 = vst.msk [vmem:[#allocation2 + $0xe8] sm:$0xff] %vm23_vm2, %v676_v35  ;;  %v986_v34 = vadd.f32 %v1681_v44, %v918_v53  ;;  %v950_v59 = vadd.f32 %v886_v51, %v822_v57  ;;  %v134_v28 = vld [vmem:[#allocation2 + $0x170] sm:$0xff] }
  0xf3   :  { %v692_v36 = vadd.f32 %v599_v39, %v133_v38  ;;  %v708_v43 = vadd.f32 %v639_v45, %v149_v41  ;;  %v522_v52 = vpop.f32.mrf.mxu0  ;;  %v838_v60 = vld [vmem:[#allocation2 + $0x1d8] sm:$0xff]  ;;  %v1097_v62 = vmax.f32 %v1033_v56, 0.0  ;;  %v1002_v63 = vadd.f32 %v1681_v44, %v934_v33  ;;  %v903_v44 = vld [vmem:[%s2132_s2 + $0x1e0] sm:$0xff]  ;;  %v562_v22 = vpop.f32.mrf.mxu1  ;;  %v150_v56 = vld [vmem:[#allocation2 + $0x1f0] sm:$0xff] }
  0xf4   :  { %v661_v55 = vadd.f32 %v522_v52, %v102_v47  ;;  %v966_v1 = vadd.f32 %v902_v54, %v838_v60  ;;  %v791_v2 = vld [vmem:[#allocation2 + $0x60] sm:$0xff]  ;;  %v1050_v5 = vmax.f32 %v986_v34, 0.0  ;;  %v1018_v8 = vadd.f32 %v2039_v7, %v950_v59 }
  0xf5   :  { %757 = vst.msk [vmem:[#allocation2 + $0x168] sm:$0xff] %vm23_vm2, %v692_v36  ;;  %v919_v9 = vadd.f32 %v855_v58, %v791_v2  ;;  %v807_v10 = vld [vmem:[#allocation2 + $0xe0] sm:$0xff]  ;;  %v1066_v11 = vmax.f32 %v1002_v63, 0.0  ;;  %v103_v58 = vld [vmem:[#allocation2 + $0x78] sm:$0xff] }
  0xf6   :  { %773 = vst.msk [vmem:[#allocation2 + $0x1e8] sm:$0xff] %vm23_vm2, %v708_v43  ;;  %v1034_v12 = vadd.f32 %v2039_v7, %v966_v1  ;;  %v935_v13 = vadd.f32 %v871_v61, %v807_v10  ;;  %v823_v14 = vld [vmem:[#allocation2 + $0x160] sm:$0xff]  ;;  %v1082_v17 = vmax.f32 %v1018_v8, 0.0  ;;  %v118_v43 = vld [vmem:[#allocation2 + $0xf0] sm:$0xff]  ;;  %v119_v61 = vld [vmem:[#allocation2 + $0xf8] sm:$0xff] }
  0xf7   :  { %726 = vst.msk [vmem:[#allocation2 + $0x70] sm:$0xff] %vm23_vm2, %v661_v55  ;;  %v987_v18 = vadd.f32 %v2039_v7, %v919_v9  ;;  %v951_v19 = vadd.f32 %v887_v3, %v823_v14  ;;  %v839_v20 = vld [vmem:[#allocation2 + $0x1e0] sm:$0xff]  ;;  %v677_v57 = vadd.f32 %v562_v22, %v118_v43  ;;  %v135_v1 = vld [vmem:[#allocation2 + $0x178] sm:$0xff]  ;;  %v905_v14 = vld [vmem:[%s2132_s2 + $0x1f0] sm:$0xff] }
  0xf8   :  { %1161 = vst.msk [vmem:[#allocation3 + $0x1d0] sm:$0xff] %vm23_vm2, %v1097_v62  ;;  %v1098_v23 = vmax.f32 %v1034_v12, 0.0  ;;  %v1003_v24 = vadd.f32 %v2039_v7, %v935_v13  ;;  %v967_v25 = vadd.f32 %v903_v44, %v839_v20  ;;  %v792_v0 = vld [vmem:[#allocation2 + $0x68] sm:$0xff]  ;;  %v889_v12 = vld [vmem:[%s2132_s2 + $0x170] sm:$0xff] }
  0xf9   :  { %1114 = vst.msk [vmem:[#allocation3 + $0x58] sm:$0xff] %vm23_vm2, %v1050_v5  ;;  %v1051_v29 = vmax.f32 %v987_v18, 0.0  ;;  %v1019_v6 = vadd.f32 %v2039_v7, %v951_v19  ;;  %v920_v30 = vadd.f32 %v856_v16, %v792_v0  ;;  %v808_v15 = vld [vmem:[#allocation2 + $0xe8] sm:$0xff]  ;;  %v151_v5 = vld [vmem:[#allocation2 + $0x1f8] sm:$0xff] }
  0xfa   :  { %1130 = vst.msk [vmem:[#allocation3 + $0xd8] sm:$0xff] %vm23_vm2, %v1066_v11  ;;  %v602_v27 = vpop.f32.mrf.mxu2  ;;  %v642_v32 = vpop.f32.mrf.mxu3  ;;  %v1067_v37 = vmax.f32 %v1003_v24, 0.0  ;;  %v1035_v38 = vadd.f32 %v2039_v7, %v967_v25  ;;  %v936_v39 = vadd.f32 %v872_v21, %v808_v15  ;;  %v873_v11 = vld [vmem:[%s2132_s2 + $0xf0] sm:$0xff]  ;;  %v858_v18 = vld [vmem:[%s2132_s2 + $0x78] sm:$0xff] }
  0xfb   :  { %1146 = vst.msk [vmem:[#allocation3 + $0x158] sm:$0xff] %vm23_vm2, %v1082_v17  ;;  %v1083_v41 = vmax.f32 %v1019_v6, 0.0  ;;  %v988_v45 = vadd.f32 %v2039_v7, %v920_v30  ;;  %v524_v34 = vpop.f32.mrf.mxu0  ;;  %v693_v60 = vadd.f32 %v602_v27, %v134_v28  ;;  %v564_v62 = vpop.f32.mrf.mxu1  ;;  %v709_v63 = vadd.f32 %v642_v32, %v150_v56  ;;  %v874_v21 = vld [vmem:[%s2132_s2 + $0xf8] sm:$0xff] }
  0xfc   :  { %1162 = vst.msk [vmem:[#allocation3 + $0x1d8] sm:$0xff] %vm23_vm2, %v1098_v23  ;;  %v824_v40 = vld [vmem:[#allocation2 + $0x168] sm:$0xff]  ;;  %v1099_v47 = vmax.f32 %v1035_v38, 0.0  ;;  %v1004_v48 = vadd.f32 %v2039_v7, %v936_v39  ;;  %v662_v3 = vadd.f32 %v524_v34, %v103_v58  ;;  %v678_v9 = vadd.f32 %v564_v62, %v119_v61  ;;  %v890_v25 = vld [vmem:[%s2132_s2 + $0x178] sm:$0xff] }
  0xfd   :  { %1115 = vst.msk [vmem:[#allocation3 + $0x60] sm:$0xff] %vm23_vm2, %v1051_v29  ;;  %v952_v46 = vadd.f32 %v888_v26, %v824_v40  ;;  %v840_v35 = vld [vmem:[#allocation2 + $0x1e8] sm:$0xff]  ;;  %v1052_v50 = vmax.f32 %v988_v45, 0.0  ;;  %v906_v29 = vld [vmem:[%s2132_s2 + $0x1f8] sm:$0xff] }
  0xfe   :  { %1131 = vst.msk [vmem:[#allocation3 + $0xe0] sm:$0xff] %vm23_vm2, %v1067_v37  ;;  %v968_v49 = vadd.f32 %v904_v31, %v840_v35  ;;  %v793_v36 = vld [vmem:[#allocation2 + $0x70] sm:$0xff]  ;;  %v1068_v52 = vmax.f32 %v1004_v48, 0.0 }
  0xff   :  { %1147 = vst.msk [vmem:[#allocation3 + $0x160] sm:$0xff] %vm23_vm2, %v1083_v41  ;;  %v1020_v42 = vadd.f32 %v2039_v7, %v952_v46  ;;  %v921_v51 = vadd.f32 %v857_v4, %v793_v36 }
 0x100   :  { %1163 = vst.msk [vmem:[#allocation3 + $0x1e0] sm:$0xff] %vm23_vm2, %v1099_v47  ;;  %v1036_v53 = vadd.f32 %v2039_v7, %v968_v49 }
 0x101   :  { %1116 = vst.msk [vmem:[#allocation3 + $0x68] sm:$0xff] %vm23_vm2, %v1052_v50  ;;  %v1084_v54 = vmax.f32 %v1020_v42, 0.0  ;;  %v989_v55 = vadd.f32 %v2039_v7, %v921_v51 }
 0x102   :  { %1132 = vst.msk [vmem:[#allocation3 + $0xe8] sm:$0xff] %vm23_vm2, %v1068_v52  ;;  %v1100_v33 = vmax.f32 %v1036_v53, 0.0  ;;  %v604_v2 = vpop.f32.mrf.mxu2  ;;  %v644_v8 = vpop.f32.mrf.mxu3 }
 0x103   :  { %1148 = vst.msk [vmem:[#allocation3 + $0x168] sm:$0xff] %vm23_vm2, %v1084_v54  ;;  %v1053_v59 = vmax.f32 %v989_v55, 0.0  ;;  %v694_v10 = vadd.f32 %v604_v2, %v135_v1  ;;  %v710_v44 = vadd.f32 %v644_v8, %v151_v5 }
 0x104   :  { %1164 = vst.msk [vmem:[#allocation3 + $0x1e8] sm:$0xff] %vm23_vm2, %v1100_v33 }
 0x105   :  { %1117 = vst.msk [vmem:[#allocation3 + $0x70] sm:$0xff] %vm23_vm2, %v1053_v59 }
 0x106   :  { %742 = vst.msk [vmem:[#allocation2 + $0xf0] sm:$0xff] %vm23_vm2, %v677_v57 }
 0x107   :  { %758 = vst.msk [vmem:[#allocation2 + $0x170] sm:$0xff] %vm23_vm2, %v693_v60 }
 0x108   :  { %774 = vst.msk [vmem:[#allocation2 + $0x1f0] sm:$0xff] %vm23_vm2, %v709_v63 }
 0x109   :  { %727 = vst.msk [vmem:[#allocation2 + $0x78] sm:$0xff] %vm23_vm2, %v662_v3 }
 0x10a   :  { %743 = vst.msk [vmem:[#allocation2 + $0xf8] sm:$0xff] %vm23_vm2, %v678_v9 }
 0x10b   :  { %759 = vst.msk [vmem:[#allocation2 + $0x178] sm:$0xff] %vm23_vm2, %v694_v10 }
 0x10c   :  { %775 = vst.msk [vmem:[#allocation2 + $0x1f8] sm:$0xff] %vm23_vm2, %v710_v44 }
 0x10d   :  { %v809_v13 = vld [vmem:[#allocation2 + $0xf0] sm:$0xff] }
 0x10e   :  { %v937_v16 = vadd.f32 %v873_v11, %v809_v13  ;;  %v825_v17 = vld [vmem:[#allocation2 + $0x170] sm:$0xff] }
 0x10f   :  { %v953_v19 = vadd.f32 %v889_v12, %v825_v17  ;;  %v841_v20 = vld [vmem:[#allocation2 + $0x1f0] sm:$0xff] }
 0x110   :  { %v1005_v22 = vadd.f32 %v2039_v7, %v937_v16  ;;  %v969_v23 = vadd.f32 %v905_v14, %v841_v20  ;;  %v794_v24 = vld [vmem:[#allocation2 + $0x78] sm:$0xff] }
 0x111   :  { %v1021_v0 = vadd.f32 %v2039_v7, %v953_v19  ;;  %v922_v26 = vadd.f32 %v858_v18, %v794_v24  ;;  %v810_v27 = vld [vmem:[#allocation2 + $0xf8] sm:$0xff] }
 0x112   :  { %v1069_v6 = vmax.f32 %v1005_v22, 0.0  ;;  %v1037_v30 = vadd.f32 %v2039_v7, %v969_v23  ;;  %v938_v15 = vadd.f32 %v874_v21, %v810_v27  ;;  %v826_v31 = vld [vmem:[#allocation2 + $0x178] sm:$0xff] }
 0x113   :  { %v1085_v32 = vmax.f32 %v1021_v0, 0.0  ;;  %v990_v37 = vadd.f32 %v2039_v7, %v922_v26  ;;  %v954_v38 = vadd.f32 %v890_v25, %v826_v31  ;;  %v842_v39 = vld [vmem:[#allocation2 + $0x1f8] sm:$0xff] }
 0x114   :  { %1133 = vst.msk [vmem:[#allocation3 + $0xf0] sm:$0xff] %vm23_vm2, %v1069_v6  ;;  %v1101_v40 = vmax.f32 %v1037_v30, 0.0  ;;  %v1006_v4 = vadd.f32 %v2039_v7, %v938_v15  ;;  %v970_v41 = vadd.f32 %v906_v29, %v842_v39 }
 0x115   :  { %1149 = vst.msk [vmem:[#allocation3 + $0x170] sm:$0xff] %vm23_vm2, %v1085_v32  ;;  %v1054_v45 = vmax.f32 %v990_v37, 0.0  ;;  %v1022_v46 = vadd.f32 %v2039_v7, %v954_v38 }
 0x116   :  { %1165 = vst.msk [vmem:[#allocation3 + $0x1f0] sm:$0xff] %vm23_vm2, %v1101_v40  ;;  %v1070_v35 = vmax.f32 %v1006_v4, 0.0  ;;  %v1038_v47 = vadd.f32 %v2039_v7, %v970_v41 }
 0x117   :  { %1118 = vst.msk [vmem:[#allocation3 + $0x78] sm:$0xff] %vm23_vm2, %v1054_v45  ;;  %v1086_v48 = vmax.f32 %v1022_v46, 0.0 }
 0x118   :  { %1134 = vst.msk [vmem:[#allocation3 + $0xf8] sm:$0xff] %vm23_vm2, %v1070_v35  ;;  %v1102_v49 = vmax.f32 %v1038_v47, 0.0 }
 0x119   :  { %1150 = vst.msk [vmem:[#allocation3 + $0x178] sm:$0xff] %vm23_vm2, %v1086_v48 }
 0x11a   :  { %1166 = vst.msk [vmem:[#allocation3 + $0x1f8] sm:$0xff] %vm23_vm2, %v1102_v49 }
 0x11b   :  { %1179 = dma.vmem_to_hbm [thread:$0]  %s1172_s19, 8192, %s1174_s21, [#allocation4], %s1414_s4, %s1414_s4, %s1415_s22  }
 0x11c   :  { %1410 = dma.done.wait [#allocation4], 8192  }
 0x11d   :  { %1411 = vsyncadd [#allocation4], 4294959104 }
 0x11e   :  { %1184 = vsyncpa [#allocation4], 1 }

</bundles_post_ra>
